<compile_context>
chip_gen: v7x
topology: tpu7x:2x2x1
jax: 0.10.0
libtpu: 0.0.40
codegen_flags: <defaults>
</compile_context>

<pallas_src>
import jax
import jax.numpy as jnp
from jax import lax
from jax.experimental import pallas as pl
from jax.experimental.pallas import tpu as pltpu

# ---- small config consistent with the module's forward ----
VOCAB = 100
MAX_POS = 32
TYPE_VOCAB = 2
HIDDEN = 32          # stand-in for BERT_H = 768
N_HEADS = 4
HEAD_DIM = HIDDEN // N_HEADS
FFN = 4 * HIDDEN
N_LAYERS = 2
OUTPUT = 5
PAD_OUT = 128        # lane-dense padded classifier output; sliced in wrapper
BATCH = 2
SEQ = 8
LN_EPS = 1e-12
ATTN_SCALE = 1.0 / (HEAD_DIM ** 0.5)


# --------------------------- fused encoder kernel ---------------------------

def _layernorm(x, gamma, beta):
    mean = jnp.mean(x, axis=-1, keepdims=True)
    xc = x - mean
    var = jnp.mean(xc * xc, axis=-1, keepdims=True)
    return xc * lax.rsqrt(var + LN_EPS) * gamma + beta


def _encoder_kernel(
    # inputs
    x_emb_ref, mask_ref, emb_g_ref, emb_b_ref,
    wqkv_ref, bqkv_ref, wo_ref, bo_ref, ln1_g_ref, ln1_b_ref,
    w1_ref, b1_ref, w2_ref, b2_ref, ln2_g_ref, ln2_b_ref,
    head_w_ref, head_b_ref,
    # outputs
    out_ref,
    # scratch
    act_ref, attn_ref,
):
    """One grid step == one encoder layer; activations live in VMEM scratch."""
    l = pl.program_id(0)

    # ---- step 0: embedding LayerNorm (no residual input) ----
    @pl.when(l == 0)
    def _init():
        act_ref[...] = _layernorm(x_emb_ref[...], emb_g_ref[...], emb_b_ref[...])

    x = act_ref[...]                                   # (B*S, H), f32

    # ---- fused QKV projection: one (H, 3H) matmul ----
    qkv = jnp.dot(x, wqkv_ref[0], preferred_element_type=jnp.float32) + bqkv_ref[0]
    q = qkv[:, 0 * HIDDEN:1 * HIDDEN]
    k = qkv[:, 1 * HIDDEN:2 * HIDDEN]
    v = qkv[:, 2 * HIDDEN:3 * HIDDEN]

    # ---- multi-head self-attention: all (batch, head) pairs in-kernel ----
    wo = wo_ref[0]                                     # (H, H)
    for b in range(BATCH):
        r0 = b * SEQ
        m_b = mask_ref[b]                              # (S, S) additive key mask
        acc = jnp.zeros((SEQ, HIDDEN), jnp.float32)
        for h in range(N_HEADS):
            c0 = h * HEAD_DIM
            qb = q[r0:r0 + SEQ, c0:c0 + HEAD_DIM]      # (S, d)
            kb = k[r0:r0 + SEQ, c0:c0 + HEAD_DIM]
            vb = v[r0:r0 + SEQ, c0:c0 + HEAD_DIM]
            s = lax.dot_general(qb, kb, (((1,), (1,)), ((), ())),
                                preferred_element_type=jnp.float32)
            s = s * ATTN_SCALE + m_b
            s = s - jnp.max(s, axis=-1, keepdims=True)
            p = jnp.exp(s)
            p = p * pl.reciprocal(jnp.sum(p, axis=-1, keepdims=True), approx=True)
            ctx = jnp.dot(p, vb, preferred_element_type=jnp.float32)   # (S, d)
            # merge heads as a sum of per-head output projections
            acc = acc + jnp.dot(ctx, wo[c0:c0 + HEAD_DIM, :],
                                preferred_element_type=jnp.float32)    # (S, H)
        attn_ref[r0:r0 + SEQ, :] = acc
    attn_out = attn_ref[...] + bo_ref[0]

    x = _layernorm(attn_out + x, ln1_g_ref[0], ln1_b_ref[0])           # add & norm

    # ---- fused FFN: w1 -> GELU -> w2 entirely in VMEM ----
    # TODO(synk): HF BERT uses exact (erf) GELU; tanh approximation used here.
    h1 = jnp.dot(x, w1_ref[0], preferred_element_type=jnp.float32) + b1_ref[0]
    h1 = jax.nn.gelu(h1, approximate=True)
    ffn_out = jnp.dot(h1, w2_ref[0], preferred_element_type=jnp.float32) + b2_ref[0]
    x = _layernorm(ffn_out + x, ln2_g_ref[0], ln2_b_ref[0])            # add & norm

    act_ref[...] = x

    # ---- last step: classifier head (ReLU -> Linear), lane-padded to 128 ----
    @pl.when(l == pl.num_programs(0) - 1)
    def _finalize():
        hx = jnp.maximum(x, 0.0)
        out_ref[...] = (jnp.dot(hx, head_w_ref[...],
                                preferred_element_type=jnp.float32)
                        + head_b_ref[...])


# --------------------------- parameters ---------------------------

def init_params(key):
    def nrm(k, shape):
        return jax.random.normal(k, shape, jnp.float32) * 0.02

    keys = iter(jax.random.split(key, 16))
    params = {
        "word_emb": nrm(next(keys), (VOCAB, HIDDEN)),
        "pos_emb": nrm(next(keys), (MAX_POS, HIDDEN)),
        "type_emb": nrm(next(keys), (TYPE_VOCAB, HIDDEN)),
        "emb_ln_g": jnp.ones((1, HIDDEN), jnp.float32),
        "emb_ln_b": jnp.zeros((1, HIDDEN), jnp.float32),
        # per-layer weights stacked on a leading layer axis, streamed via index_map
        "wqkv": nrm(next(keys), (N_LAYERS, HIDDEN, 3 * HIDDEN)),
        "bqkv": jnp.zeros((N_LAYERS, 1, 3 * HIDDEN), jnp.float32),
        "wo": nrm(next(keys), (N_LAYERS, HIDDEN, HIDDEN)),
        "bo": jnp.zeros((N_LAYERS, 1, HIDDEN), jnp.float32),
        "ln1_g": jnp.ones((N_LAYERS, 1, HIDDEN), jnp.float32),
        "ln1_b": jnp.zeros((N_LAYERS, 1, HIDDEN), jnp.float32),
        "w1": nrm(next(keys), (N_LAYERS, HIDDEN, FFN)),
        "b1": jnp.zeros((N_LAYERS, 1, FFN), jnp.float32),
        "w2": nrm(next(keys), (N_LAYERS, FFN, HIDDEN)),
        "b2": jnp.zeros((N_LAYERS, 1, HIDDEN), jnp.float32),
        "ln2_g": jnp.ones((N_LAYERS, 1, HIDDEN), jnp.float32),
        "ln2_b": jnp.zeros((N_LAYERS, 1, HIDDEN), jnp.float32),
    }
    head_w = nrm(next(keys), (HIDDEN, OUTPUT))
    head_b = jnp.zeros((OUTPUT,), jnp.float32)
    # zero-pad the head to 128 output lanes (lane-dense store); sliced in wrapper
    params["head_w"] = jnp.zeros((HIDDEN, PAD_OUT), jnp.float32).at[:, :OUTPUT].set(head_w)
    params["head_b"] = jnp.zeros((1, PAD_OUT), jnp.float32).at[:, :OUTPUT].set(head_b)
    return params


# --------------------------- forward ---------------------------

def my_classifier_forward(params, input_ids, attention_mask):
    B, S = input_ids.shape
    # Embedding gathers are glue (plain JAX); everything else is one fused kernel.
    x = (params["word_emb"][input_ids]
         + params["pos_emb"][:S][None, :, :]
         + params["type_emb"][0][None, None, :])                       # (B, S, H)
    x2 = x.reshape(B * S, HIDDEN)

    # HF-style additive key mask, pre-broadcast to (B, S, S) so the kernel can
    # index the leading (batch) axis instead of slicing sublanes.
    mask_add = (1.0 - attention_mask.astype(jnp.float32)) * -10000.0   # (B, S)
    mask_bss = jnp.broadcast_to(mask_add[:, None, :], (B, S, S))

    def full2(shape):
        return pl.BlockSpec(shape, lambda l: (0, 0))

    def full3(shape):
        return pl.BlockSpec(shape, lambda l: (0, 0, 0))

    def per_layer(shape):
        return pl.BlockSpec(shape, lambda l: (l, 0, 0))

    out = pl.pallas_call(
        _encoder_kernel,
        out_shape=jax.ShapeDtypeStruct((B * S, PAD_OUT), jnp.float32),
        grid_spec=pltpu.PrefetchScalarGridSpec(
            num_scalar_prefetch=0,
            grid=(N_LAYERS,),
            in_specs=[
                full2((B * S, HIDDEN)),                 # embeddings
                full3((B, S, S)),                       # additive attention mask
                full2((1, HIDDEN)),                     # emb LN gamma
                full2((1, HIDDEN)),                     # emb LN beta
                per_layer((1, HIDDEN, 3 * HIDDEN)),     # wqkv
                per_layer((1, 1, 3 * HIDDEN)),          # bqkv
                per_layer((1, HIDDEN, HIDDEN)),         # wo
                per_layer((1, 1, HIDDEN)),              # bo
                per_layer((1, 1, HIDDEN)),              # ln1 gamma
                per_layer((1, 1, HIDDEN)),              # ln1 beta
                per_layer((1, HIDDEN, FFN)),            # w1
                per_layer((1, 1, FFN)),                 # b1
                per_layer((1, FFN, HIDDEN)),            # w2
                per_layer((1, 1, HIDDEN)),              # b2
                per_layer((1, 1, HIDDEN)),              # ln2 gamma
                per_layer((1, 1, HIDDEN)),              # ln2 beta
                full2((HIDDEN, PAD_OUT)),               # head W (zero-padded)
                full2((1, PAD_OUT)),                    # head b (zero-padded)
            ],
            out_specs=pl.BlockSpec((B * S, PAD_OUT), lambda l: (0, 0)),
            scratch_shapes=[
                pltpu.VMEM((B * S, HIDDEN), jnp.float32),   # resident activations
                pltpu.VMEM((B * S, HIDDEN), jnp.float32),   # attention assembly
            ],
        ),
        compiler_params=pltpu.CompilerParams(
            dimension_semantics=("arbitrary",)),
    )(x2, mask_bss, params["emb_ln_g"], params["emb_ln_b"],
      params["wqkv"], params["bqkv"], params["wo"], params["bo"],
      params["ln1_g"], params["ln1_b"], params["w1"], params["b1"],
      params["w2"], params["b2"], params["ln2_g"], params["ln2_b"],
      params["head_w"], params["head_b"])

    # take [CLS] rows (token 0 of each sequence) and the real output columns
    logits = out.reshape(B, S, PAD_OUT)[:, 0, :OUTPUT]
    return logits


# --------------------------- main ---------------------------

if __name__ == "__main__":
    root = jax.random.PRNGKey(0)
    pkey, ikey = jax.random.split(root, 2)

    params = init_params(pkey)
    input_ids = jax.random.randint(ikey, (BATCH, SEQ), 0, VOCAB, dtype=jnp.int32)
    lengths = jnp.array([SEQ, SEQ - 3], dtype=jnp.int32)
    attention_mask = (jnp.arange(SEQ)[None, :] < lengths[:, None]).astype(jnp.int32)

    fwd = jax.jit(lambda ids, mask: my_classifier_forward(params, ids, mask))
    logits = fwd(input_ids, attention_mask)
    jax.block_until_ready(logits)

    assert logits.shape == (BATCH, OUTPUT), logits.shape
    assert logits.dtype == jnp.float32
    assert bool(jnp.all(jnp.isfinite(logits)))
    print("KERNEL_OK")
</pallas_src>

<mosaic_0001>
module attributes {stable_mosaic.version = 11 : i64} {
  func.func @_encoder_kernel(%arg0: i32, %arg1: memref<16x32xf32, #tpu.memory_space<vmem>>, %arg2: memref<2x8x8xf32, #tpu.memory_space<vmem>>, %arg3: memref<1x32xf32, #tpu.memory_space<vmem>>, %arg4: memref<1x32xf32, #tpu.memory_space<vmem>>, %arg5: memref<1x32x96xf32, #tpu.memory_space<vmem>>, %arg6: memref<1x1x96xf32, #tpu.memory_space<vmem>>, %arg7: memref<1x32x32xf32, #tpu.memory_space<vmem>>, %arg8: memref<1x1x32xf32, #tpu.memory_space<vmem>>, %arg9: memref<1x1x32xf32, #tpu.memory_space<vmem>>, %arg10: memref<1x1x32xf32, #tpu.memory_space<vmem>>, %arg11: memref<1x32x128xf32, #tpu.memory_space<vmem>>, %arg12: memref<1x1x128xf32, #tpu.memory_space<vmem>>, %arg13: memref<1x128x32xf32, #tpu.memory_space<vmem>>, %arg14: memref<1x1x32xf32, #tpu.memory_space<vmem>>, %arg15: memref<1x1x32xf32, #tpu.memory_space<vmem>>, %arg16: memref<1x1x32xf32, #tpu.memory_space<vmem>>, %arg17: memref<32x128xf32, #tpu.memory_space<vmem>>, %arg18: memref<1x128xf32, #tpu.memory_space<vmem>>, %arg19: memref<16x128xf32, #tpu.memory_space<vmem>>, %arg20: memref<16x32xf32, #tpu.memory_space<vmem>>, %arg21: memref<16x32xf32, #tpu.memory_space<vmem>>) attributes {dimension_semantics = [#tpu.dimension_semantics<arbitrary>], iteration_bounds = array<i64: 2>, scalar_prefetch = 0 : i64, scratch_operands = 2 : i64, tpu.core_type = #tpu.core_type<tc>, window_params = [{pipeline_mode = #tpu.pipeline_mode<synchronous>, transform_indices = @transform_0, window_bounds = array<i64: 16, 32>}, {pipeline_mode = #tpu.pipeline_mode<synchronous>, transform_indices = @transform_1, window_bounds = array<i64: 2, 8, 8>}, {pipeline_mode = #tpu.pipeline_mode<synchronous>, transform_indices = @transform_2, window_bounds = array<i64: 1, 32>}, {pipeline_mode = #tpu.pipeline_mode<synchronous>, transform_indices = @transform_3, window_bounds = array<i64: 1, 32>}, {transform_indices = @transform_4, window_bounds = array<i64: 1, 32, 96>}, {transform_indices = @transform_5, window_bounds = array<i64: 1, 1, 96>}, {transform_indices = @transform_6, window_bounds = array<i64: 1, 32, 32>}, {transform_indices = @transform_7, window_bounds = array<i64: 1, 1, 32>}, {transform_indices = @transform_8, window_bounds = array<i64: 1, 1, 32>}, {transform_indices = @transform_9, window_bounds = array<i64: 1, 1, 32>}, {transform_indices = @transform_10, window_bounds = array<i64: 1, 32, 128>}, {transform_indices = @transform_11, window_bounds = array<i64: 1, 1, 128>}, {transform_indices = @transform_12, window_bounds = array<i64: 1, 128, 32>}, {transform_indices = @transform_13, window_bounds = array<i64: 1, 1, 32>}, {transform_indices = @transform_14, window_bounds = array<i64: 1, 1, 32>}, {transform_indices = @transform_15, window_bounds = array<i64: 1, 1, 32>}, {pipeline_mode = #tpu.pipeline_mode<synchronous>, transform_indices = @transform_16, window_bounds = array<i64: 32, 128>}, {pipeline_mode = #tpu.pipeline_mode<synchronous>, transform_indices = @transform_17, window_bounds = array<i64: 1, 128>}, {pipeline_mode = #tpu.pipeline_mode<synchronous>, transform_indices = @transform_18, window_bounds = array<i64: 16, 128>}]} {
    %c0_i32 = arith.constant 0 : i32
    %0 = arith.cmpi eq, %arg0, %c0_i32 : i32
    %1 = arith.extui %0 : i1 to i32
    %c0_i32_0 = arith.constant 0 : i32
    %2 = arith.cmpi ne, %1, %c0_i32_0 : i32
    scf.if %2 {
      %c0_117 = arith.constant 0 : index
      %c0_118 = arith.constant 0 : index
      %278 = vector.load %arg1[%c0_117, %c0_118] : memref<16x32xf32, #tpu.memory_space<vmem>>, vector<16x32xf32>
      %c0_119 = arith.constant 0 : index
      %c0_120 = arith.constant 0 : index
      %279 = vector.load %arg3[%c0_119, %c0_120] : memref<1x32xf32, #tpu.memory_space<vmem>>, vector<1x32xf32>
      %c0_121 = arith.constant 0 : index
      %c0_122 = arith.constant 0 : index
      %280 = vector.load %arg4[%c0_121, %c0_122] : memref<1x32xf32, #tpu.memory_space<vmem>>, vector<1x32xf32>
      %cst_123 = arith.constant dense<0.000000e+00> : vector<16xf32>
      %281 = vector.multi_reduction <add>, %278, %cst_123 [1] : vector<16x32xf32> to vector<16xf32>
      %282 = vector.shape_cast %281 : vector<16xf32> to vector<16x1xf32>
      %cst_124 = arith.constant 3.200000e+01 : f32
      %283 = vector.broadcast %cst_124 : f32 to vector<16x1xf32>
      %284 = arith.divf %282, %283 : vector<16x1xf32>
      %285 = vector.broadcast %284 : vector<16x1xf32> to vector<16x32xf32>
      %286 = arith.subf %278, %285 : vector<16x32xf32>
      %287 = arith.mulf %286, %286 : vector<16x32xf32>
      %cst_125 = arith.constant dense<0.000000e+00> : vector<16xf32>
      %288 = vector.multi_reduction <add>, %287, %cst_125 [1] : vector<16x32xf32> to vector<16xf32>
      %289 = vector.shape_cast %288 : vector<16xf32> to vector<16x1xf32>
      %cst_126 = arith.constant 3.200000e+01 : f32
      %290 = vector.broadcast %cst_126 : f32 to vector<16x1xf32>
      %291 = arith.divf %289, %290 : vector<16x1xf32>
      %cst_127 = arith.constant 9.99999996E-13 : f32
      %292 = vector.broadcast %cst_127 : f32 to vector<16x1xf32>
      %293 = arith.addf %291, %292 : vector<16x1xf32>
      %294 = math.rsqrt %293 : vector<16x1xf32>
      %295 = vector.broadcast %294 : vector<16x1xf32> to vector<16x32xf32>
      %296 = arith.mulf %286, %295 : vector<16x32xf32>
      %297 = vector.broadcast %279 : vector<1x32xf32> to vector<16x32xf32>
      %298 = arith.mulf %296, %297 : vector<16x32xf32>
      %299 = vector.broadcast %280 : vector<1x32xf32> to vector<16x32xf32>
      %300 = arith.addf %298, %299 : vector<16x32xf32>
      %c0_128 = arith.constant 0 : index
      %c0_129 = arith.constant 0 : index
      %301 = vector.load %arg20[%c0_128, %c0_129] : memref<16x32xf32, #tpu.memory_space<vmem>>, vector<16x32xf32>
      tpu.vector_store %arg20[%c0_128, %c0_129], %300 {strides = array<i32>} : memref<16x32xf32, #tpu.memory_space<vmem>>, vector<16x32xf32>,
    } else {
    }
    %c0 = arith.constant 0 : index
    %c0_1 = arith.constant 0 : index
    %3 = vector.load %arg20[%c0, %c0_1] : memref<16x32xf32, #tpu.memory_space<vmem>>, vector<16x32xf32>
    %c0_2 = arith.constant 0 : index
    %c0_3 = arith.constant 0 : index
    %c0_4 = arith.constant 0 : index
    %4 = vector.load %arg5[%c0_2, %c0_3, %c0_4] : memref<1x32x96xf32, #tpu.memory_space<vmem>>, vector<1x32x96xf32>
    %5 = vector.shape_cast %4 : vector<1x32x96xf32> to vector<32x96xf32>
    %cst = arith.constant dense<0.000000e+00> : vector<16x96xf32>
    %6 = tpu.matmul %3, %5, %cst {dimension_numbers = #tpu.dot_dimension_numbers<[1], [0], [0], [1], [0, 0, 1, 1], [], []>} : vector<16x32xf32>, vector<32x96xf32>, vector<16x96xf32> -> vector<16x96xf32>
    %c0_5 = arith.constant 0 : index
    %c0_6 = arith.constant 0 : index
    %c0_7 = arith.constant 0 : index
    %7 = vector.load %arg6[%c0_5, %c0_6, %c0_7] : memref<1x1x96xf32, #tpu.memory_space<vmem>>, vector<1x1x96xf32>
    %8 = vector.shape_cast %7 : vector<1x1x96xf32> to vector<1x96xf32>
    %9 = vector.broadcast %8 : vector<1x96xf32> to vector<16x96xf32>
    %10 = arith.addf %6, %9 : vector<16x96xf32>
    %11 = vector.extract_strided_slice %10 {offsets = [0, 0], sizes = [16, 32], strides = [1, 1]} : vector<16x96xf32> to vector<16x32xf32>
    %12 = vector.extract_strided_slice %10 {offsets = [0, 32], sizes = [16, 32], strides = [1, 1]} : vector<16x96xf32> to vector<16x32xf32>
    %13 = vector.extract_strided_slice %10 {offsets = [0, 64], sizes = [16, 32], strides = [1, 1]} : vector<16x96xf32> to vector<16x32xf32>
    %c0_8 = arith.constant 0 : index
    %c0_9 = arith.constant 0 : index
    %c0_10 = arith.constant 0 : index
    %14 = vector.load %arg7[%c0_8, %c0_9, %c0_10] : memref<1x32x32xf32, #tpu.memory_space<vmem>>, vector<1x32x32xf32>
    %15 = vector.shape_cast %14 : vector<1x32x32xf32> to vector<32x32xf32>
    %c0_11 = arith.constant 0 : index
    %c0_12 = arith.constant 0 : index
    %c0_13 = arith.constant 0 : index
    %16 = vector.load %arg2[%c0_11, %c0_12, %c0_13] : memref<2x8x8xf32, #tpu.memory_space<vmem>>, vector<1x8x8xf32>
    %17 = vector.shape_cast %16 : vector<1x8x8xf32> to vector<8x8xf32>
    %cst_14 = arith.constant 0.000000e+00 : f32
    %18 = vector.broadcast %cst_14 : f32 to vector<8x32xf32>
    %19 = vector.extract_strided_slice %11 {offsets = [0, 0], sizes = [8, 8], strides = [1, 1]} : vector<16x32xf32> to vector<8x8xf32>
    %20 = vector.extract_strided_slice %12 {offsets = [0, 0], sizes = [8, 8], strides = [1, 1]} : vector<16x32xf32> to vector<8x8xf32>
    %21 = vector.extract_strided_slice %13 {offsets = [0, 0], sizes = [8, 8], strides = [1, 1]} : vector<16x32xf32> to vector<8x8xf32>
    %cst_15 = arith.constant dense<0.000000e+00> : vector<8x8xf32>
    %22 = tpu.matmul %19, %20, %cst_15 {dimension_numbers = #tpu.dot_dimension_numbers<[1], [1], [0], [0], [0, 0, 1, 0], [], []>} : vector<8x8xf32>, vector<8x8xf32>, vector<8x8xf32> -> vector<8x8xf32>
    %cst_16 = arith.constant 0.353553385 : f32
    %23 = vector.broadcast %cst_16 : f32 to vector<8x8xf32>
    %24 = arith.mulf %22, %23 : vector<8x8xf32>
    %25 = arith.addf %24, %17 : vector<8x8xf32>
    %cst_17 = arith.constant dense<0xFF800000> : vector<8xf32>
    %26 = vector.multi_reduction <maximumf>, %25, %cst_17 [1] : vector<8x8xf32> to vector<8xf32>
    %27 = vector.shape_cast %26 : vector<8xf32> to vector<8x1xf32>
    %28 = vector.broadcast %27 : vector<8x1xf32> to vector<8x8xf32>
    %29 = arith.subf %25, %28 : vector<8x8xf32>
    %30 = math.exp %29 : vector<8x8xf32>
    %cst_18 = arith.constant dense<0.000000e+00> : vector<8xf32>
    %31 = vector.multi_reduction <add>, %30, %cst_18 [1] : vector<8x8xf32> to vector<8xf32>
    %32 = vector.shape_cast %31 : vector<8xf32> to vector<8x1xf32>
    %33 = tpu.reciprocal %32 {approx = true} : vector<8x1xf32> -> vector<8x1xf32>
    %34 = vector.broadcast %33 : vector<8x1xf32> to vector<8x8xf32>
    %35 = arith.mulf %30, %34 : vector<8x8xf32>
    %cst_19 = arith.constant dense<0.000000e+00> : vector<8x8xf32>
    %36 = tpu.matmul %35, %21, %cst_19 {dimension_numbers = #tpu.dot_dimension_numbers<[1], [0], [0], [1], [0, 0, 1, 1], [], []>} : vector<8x8xf32>, vector<8x8xf32>, vector<8x8xf32> -> vector<8x8xf32>
    %37 = vector.extract_strided_slice %15 {offsets = [0, 0], sizes = [8, 32], strides = [1, 1]} : vector<32x32xf32> to vector<8x32xf32>
    %cst_20 = arith.constant dense<0.000000e+00> : vector<8x32xf32>
    %38 = tpu.matmul %36, %37, %cst_20 {dimension_numbers = #tpu.dot_dimension_numbers<[1], [0], [0], [1], [0, 0, 1, 1], [], []>} : vector<8x8xf32>, vector<8x32xf32>, vector<8x32xf32> -> vector<8x32xf32>
    %39 = arith.addf %18, %38 : vector<8x32xf32>
    %40 = vector.extract_strided_slice %11 {offsets = [0, 8], sizes = [8, 8], strides = [1, 1]} : vector<16x32xf32> to vector<8x8xf32>
    %41 = vector.extract_strided_slice %12 {offsets = [0, 8], sizes = [8, 8], strides = [1, 1]} : vector<16x32xf32> to vector<8x8xf32>
    %42 = vector.extract_strided_slice %13 {offsets = [0, 8], sizes = [8, 8], strides = [1, 1]} : vector<16x32xf32> to vector<8x8xf32>
    %cst_21 = arith.constant dense<0.000000e+00> : vector<8x8xf32>
    %43 = tpu.matmul %40, %41, %cst_21 {dimension_numbers = #tpu.dot_dimension_numbers<[1], [1], [0], [0], [0, 0, 1, 0], [], []>} : vector<8x8xf32>, vector<8x8xf32>, vector<8x8xf32> -> vector<8x8xf32>
    %cst_22 = arith.constant 0.353553385 : f32
    %44 = vector.broadcast %cst_22 : f32 to vector<8x8xf32>
    %45 = arith.mulf %43, %44 : vector<8x8xf32>
    %46 = arith.addf %45, %17 : vector<8x8xf32>
    %cst_23 = arith.constant dense<0xFF800000> : vector<8xf32>
    %47 = vector.multi_reduction <maximumf>, %46, %cst_23 [1] : vector<8x8xf32> to vector<8xf32>
    %48 = vector.shape_cast %47 : vector<8xf32> to vector<8x1xf32>
    %49 = vector.broadcast %48 : vector<8x1xf32> to vector<8x8xf32>
    %50 = arith.subf %46, %49 : vector<8x8xf32>
    %51 = math.exp %50 : vector<8x8xf32>
    %cst_24 = arith.constant dense<0.000000e+00> : vector<8xf32>
    %52 = vector.multi_reduction <add>, %51, %cst_24 [1] : vector<8x8xf32> to vector<8xf32>
    %53 = vector.shape_cast %52 : vector<8xf32> to vector<8x1xf32>
    %54 = tpu.reciprocal %53 {approx = true} : vector<8x1xf32> -> vector<8x1xf32>
    %55 = vector.broadcast %54 : vector<8x1xf32> to vector<8x8xf32>
    %56 = arith.mulf %51, %55 : vector<8x8xf32>
    %cst_25 = arith.constant dense<0.000000e+00> : vector<8x8xf32>
    %57 = tpu.matmul %56, %42, %cst_25 {dimension_numbers = #tpu.dot_dimension_numbers<[1], [0], [0], [1], [0, 0, 1, 1], [], []>} : vector<8x8xf32>, vector<8x8xf32>, vector<8x8xf32> -> vector<8x8xf32>
    %58 = vector.extract_strided_slice %15 {offsets = [8, 0], sizes = [8, 32], strides = [1, 1]} : vector<32x32xf32> to vector<8x32xf32>
    %cst_26 = arith.constant dense<0.000000e+00> : vector<8x32xf32>
    %59 = tpu.matmul %57, %58, %cst_26 {dimension_numbers = #tpu.dot_dimension_numbers<[1], [0], [0], [1], [0, 0, 1, 1], [], []>} : vector<8x8xf32>, vector<8x32xf32>, vector<8x32xf32> -> vector<8x32xf32>
    %60 = arith.addf %39, %59 : vector<8x32xf32>
    %61 = vector.extract_strided_slice %11 {offsets = [0, 16], sizes = [8, 8], strides = [1, 1]} : vector<16x32xf32> to vector<8x8xf32>
    %62 = vector.extract_strided_slice %12 {offsets = [0, 16], sizes = [8, 8], strides = [1, 1]} : vector<16x32xf32> to vector<8x8xf32>
    %63 = vector.extract_strided_slice %13 {offsets = [0, 16], sizes = [8, 8], strides = [1, 1]} : vector<16x32xf32> to vector<8x8xf32>
    %cst_27 = arith.constant dense<0.000000e+00> : vector<8x8xf32>
    %64 = tpu.matmul %61, %62, %cst_27 {dimension_numbers = #tpu.dot_dimension_numbers<[1], [1], [0], [0], [0, 0, 1, 0], [], []>} : vector<8x8xf32>, vector<8x8xf32>, vector<8x8xf32> -> vector<8x8xf32>
    %cst_28 = arith.constant 0.353553385 : f32
    %65 = vector.broadcast %cst_28 : f32 to vector<8x8xf32>
    %66 = arith.mulf %64, %65 : vector<8x8xf32>
    %67 = arith.addf %66, %17 : vector<8x8xf32>
    %cst_29 = arith.constant dense<0xFF800000> : vector<8xf32>
    %68 = vector.multi_reduction <maximumf>, %67, %cst_29 [1] : vector<8x8xf32> to vector<8xf32>
    %69 = vector.shape_cast %68 : vector<8xf32> to vector<8x1xf32>
    %70 = vector.broadcast %69 : vector<8x1xf32> to vector<8x8xf32>
    %71 = arith.subf %67, %70 : vector<8x8xf32>
    %72 = math.exp %71 : vector<8x8xf32>
    %cst_30 = arith.constant dense<0.000000e+00> : vector<8xf32>
    %73 = vector.multi_reduction <add>, %72, %cst_30 [1] : vector<8x8xf32> to vector<8xf32>
    %74 = vector.shape_cast %73 : vector<8xf32> to vector<8x1xf32>
    %75 = tpu.reciprocal %74 {approx = true} : vector<8x1xf32> -> vector<8x1xf32>
    %76 = vector.broadcast %75 : vector<8x1xf32> to vector<8x8xf32>
    %77 = arith.mulf %72, %76 : vector<8x8xf32>
    %cst_31 = arith.constant dense<0.000000e+00> : vector<8x8xf32>
    %78 = tpu.matmul %77, %63, %cst_31 {dimension_numbers = #tpu.dot_dimension_numbers<[1], [0], [0], [1], [0, 0, 1, 1], [], []>} : vector<8x8xf32>, vector<8x8xf32>, vector<8x8xf32> -> vector<8x8xf32>
    %79 = vector.extract_strided_slice %15 {offsets = [16, 0], sizes = [8, 32], strides = [1, 1]} : vector<32x32xf32> to vector<8x32xf32>
    %cst_32 = arith.constant dense<0.000000e+00> : vector<8x32xf32>
    %80 = tpu.matmul %78, %79, %cst_32 {dimension_numbers = #tpu.dot_dimension_numbers<[1], [0], [0], [1], [0, 0, 1, 1], [], []>} : vector<8x8xf32>, vector<8x32xf32>, vector<8x32xf32> -> vector<8x32xf32>
    %81 = arith.addf %60, %80 : vector<8x32xf32>
    %82 = vector.extract_strided_slice %11 {offsets = [0, 24], sizes = [8, 8], strides = [1, 1]} : vector<16x32xf32> to vector<8x8xf32>
    %83 = vector.extract_strided_slice %12 {offsets = [0, 24], sizes = [8, 8], strides = [1, 1]} : vector<16x32xf32> to vector<8x8xf32>
    %84 = vector.extract_strided_slice %13 {offsets = [0, 24], sizes = [8, 8], strides = [1, 1]} : vector<16x32xf32> to vector<8x8xf32>
    %cst_33 = arith.constant dense<0.000000e+00> : vector<8x8xf32>
    %85 = tpu.matmul %82, %83, %cst_33 {dimension_numbers = #tpu.dot_dimension_numbers<[1], [1], [0], [0], [0, 0, 1, 0], [], []>} : vector<8x8xf32>, vector<8x8xf32>, vector<8x8xf32> -> vector<8x8xf32>
    %cst_34 = arith.constant 0.353553385 : f32
    %86 = vector.broadcast %cst_34 : f32 to vector<8x8xf32>
    %87 = arith.mulf %85, %86 : vector<8x8xf32>
    %88 = arith.addf %87, %17 : vector<8x8xf32>
    %cst_35 = arith.constant dense<0xFF800000> : vector<8xf32>
    %89 = vector.multi_reduction <maximumf>, %88, %cst_35 [1] : vector<8x8xf32> to vector<8xf32>
    %90 = vector.shape_cast %89 : vector<8xf32> to vector<8x1xf32>
    %91 = vector.broadcast %90 : vector<8x1xf32> to vector<8x8xf32>
    %92 = arith.subf %88, %91 : vector<8x8xf32>
    %93 = math.exp %92 : vector<8x8xf32>
    %cst_36 = arith.constant dense<0.000000e+00> : vector<8xf32>
    %94 = vector.multi_reduction <add>, %93, %cst_36 [1] : vector<8x8xf32> to vector<8xf32>
    %95 = vector.shape_cast %94 : vector<8xf32> to vector<8x1xf32>
    %96 = tpu.reciprocal %95 {approx = true} : vector<8x1xf32> -> vector<8x1xf32>
    %97 = vector.broadcast %96 : vector<8x1xf32> to vector<8x8xf32>
    %98 = arith.mulf %93, %97 : vector<8x8xf32>
    %cst_37 = arith.constant dense<0.000000e+00> : vector<8x8xf32>
    %99 = tpu.matmul %98, %84, %cst_37 {dimension_numbers = #tpu.dot_dimension_numbers<[1], [0], [0], [1], [0, 0, 1, 1], [], []>} : vector<8x8xf32>, vector<8x8xf32>, vector<8x8xf32> -> vector<8x8xf32>
    %100 = vector.extract_strided_slice %15 {offsets = [24, 0], sizes = [8, 32], strides = [1, 1]} : vector<32x32xf32> to vector<8x32xf32>
    %cst_38 = arith.constant dense<0.000000e+00> : vector<8x32xf32>
    %101 = tpu.matmul %99, %100, %cst_38 {dimension_numbers = #tpu.dot_dimension_numbers<[1], [0], [0], [1], [0, 0, 1, 1], [], []>} : vector<8x8xf32>, vector<8x32xf32>, vector<8x32xf32> -> vector<8x32xf32>
    %102 = arith.addf %81, %101 : vector<8x32xf32>
    %c0_39 = arith.constant 0 : index
    %c0_40 = arith.constant 0 : index
    %103 = vector.load %arg21[%c0_39, %c0_40] : memref<16x32xf32, #tpu.memory_space<vmem>>, vector<8x32xf32>
    tpu.vector_store %arg21[%c0_39, %c0_40], %102 {strides = array<i32>} : memref<16x32xf32, #tpu.memory_space<vmem>>, vector<8x32xf32>,
    %c1 = arith.constant 1 : index
    %c0_41 = arith.constant 0 : index
    %c0_42 = arith.constant 0 : index
    %104 = vector.load %arg2[%c1, %c0_41, %c0_42] : memref<2x8x8xf32, #tpu.memory_space<vmem>>, vector<1x8x8xf32>
    %105 = vector.shape_cast %104 : vector<1x8x8xf32> to vector<8x8xf32>
    %cst_43 = arith.constant 0.000000e+00 : f32
    %106 = vector.broadcast %cst_43 : f32 to vector<8x32xf32>
    %107 = vector.extract_strided_slice %11 {offsets = [8, 0], sizes = [8, 8], strides = [1, 1]} : vector<16x32xf32> to vector<8x8xf32>
    %108 = vector.extract_strided_slice %12 {offsets = [8, 0], sizes = [8, 8], strides = [1, 1]} : vector<16x32xf32> to vector<8x8xf32>
    %109 = vector.extract_strided_slice %13 {offsets = [8, 0], sizes = [8, 8], strides = [1, 1]} : vector<16x32xf32> to vector<8x8xf32>
    %cst_44 = arith.constant dense<0.000000e+00> : vector<8x8xf32>
    %110 = tpu.matmul %107, %108, %cst_44 {dimension_numbers = #tpu.dot_dimension_numbers<[1], [1], [0], [0], [0, 0, 1, 0], [], []>} : vector<8x8xf32>, vector<8x8xf32>, vector<8x8xf32> -> vector<8x8xf32>
    %cst_45 = arith.constant 0.353553385 : f32
    %111 = vector.broadcast %cst_45 : f32 to vector<8x8xf32>
    %112 = arith.mulf %110, %111 : vector<8x8xf32>
    %113 = arith.addf %112, %105 : vector<8x8xf32>
    %cst_46 = arith.constant dense<0xFF800000> : vector<8xf32>
    %114 = vector.multi_reduction <maximumf>, %113, %cst_46 [1] : vector<8x8xf32> to vector<8xf32>
    %115 = vector.shape_cast %114 : vector<8xf32> to vector<8x1xf32>
    %116 = vector.broadcast %115 : vector<8x1xf32> to vector<8x8xf32>
    %117 = arith.subf %113, %116 : vector<8x8xf32>
    %118 = math.exp %117 : vector<8x8xf32>
    %cst_47 = arith.constant dense<0.000000e+00> : vector<8xf32>
    %119 = vector.multi_reduction <add>, %118, %cst_47 [1] : vector<8x8xf32> to vector<8xf32>
    %120 = vector.shape_cast %119 : vector<8xf32> to vector<8x1xf32>
    %121 = tpu.reciprocal %120 {approx = true} : vector<8x1xf32> -> vector<8x1xf32>
    %122 = vector.broadcast %121 : vector<8x1xf32> to vector<8x8xf32>
    %123 = arith.mulf %118, %122 : vector<8x8xf32>
    %cst_48 = arith.constant dense<0.000000e+00> : vector<8x8xf32>
    %124 = tpu.matmul %123, %109, %cst_48 {dimension_numbers = #tpu.dot_dimension_numbers<[1], [0], [0], [1], [0, 0, 1, 1], [], []>} : vector<8x8xf32>, vector<8x8xf32>, vector<8x8xf32> -> vector<8x8xf32>
    %125 = vector.extract_strided_slice %15 {offsets = [0, 0], sizes = [8, 32], strides = [1, 1]} : vector<32x32xf32> to vector<8x32xf32>
    %cst_49 = arith.constant dense<0.000000e+00> : vector<8x32xf32>
    %126 = tpu.matmul %124, %125, %cst_49 {dimension_numbers = #tpu.dot_dimension_numbers<[1], [0], [0], [1], [0, 0, 1, 1], [], []>} : vector<8x8xf32>, vector<8x32xf32>, vector<8x32xf32> -> vector<8x32xf32>
    %127 = arith.addf %106, %126 : vector<8x32xf32>
    %128 = vector.extract_strided_slice %11 {offsets = [8, 8], sizes = [8, 8], strides = [1, 1]} : vector<16x32xf32> to vector<8x8xf32>
    %129 = vector.extract_strided_slice %12 {offsets = [8, 8], sizes = [8, 8], strides = [1, 1]} : vector<16x32xf32> to vector<8x8xf32>
    %130 = vector.extract_strided_slice %13 {offsets = [8, 8], sizes = [8, 8], strides = [1, 1]} : vector<16x32xf32> to vector<8x8xf32>
    %cst_50 = arith.constant dense<0.000000e+00> : vector<8x8xf32>
    %131 = tpu.matmul %128, %129, %cst_50 {dimension_numbers = #tpu.dot_dimension_numbers<[1], [1], [0], [0], [0, 0, 1, 0], [], []>} : vector<8x8xf32>, vector<8x8xf32>, vector<8x8xf32> -> vector<8x8xf32>
    %cst_51 = arith.constant 0.353553385 : f32
    %132 = vector.broadcast %cst_51 : f32 to vector<8x8xf32>
    %133 = arith.mulf %131, %132 : vector<8x8xf32>
    %134 = arith.addf %133, %105 : vector<8x8xf32>
    %cst_52 = arith.constant dense<0xFF800000> : vector<8xf32>
    %135 = vector.multi_reduction <maximumf>, %134, %cst_52 [1] : vector<8x8xf32> to vector<8xf32>
    %136 = vector.shape_cast %135 : vector<8xf32> to vector<8x1xf32>
    %137 = vector.broadcast %136 : vector<8x1xf32> to vector<8x8xf32>
    %138 = arith.subf %134, %137 : vector<8x8xf32>
    %139 = math.exp %138 : vector<8x8xf32>
    %cst_53 = arith.constant dense<0.000000e+00> : vector<8xf32>
    %140 = vector.multi_reduction <add>, %139, %cst_53 [1] : vector<8x8xf32> to vector<8xf32>
    %141 = vector.shape_cast %140 : vector<8xf32> to vector<8x1xf32>
    %142 = tpu.reciprocal %141 {approx = true} : vector<8x1xf32> -> vector<8x1xf32>
    %143 = vector.broadcast %142 : vector<8x1xf32> to vector<8x8xf32>
    %144 = arith.mulf %139, %143 : vector<8x8xf32>
    %cst_54 = arith.constant dense<0.000000e+00> : vector<8x8xf32>
    %145 = tpu.matmul %144, %130, %cst_54 {dimension_numbers = #tpu.dot_dimension_numbers<[1], [0], [0], [1], [0, 0, 1, 1], [], []>} : vector<8x8xf32>, vector<8x8xf32>, vector<8x8xf32> -> vector<8x8xf32>
    %146 = vector.extract_strided_slice %15 {offsets = [8, 0], sizes = [8, 32], strides = [1, 1]} : vector<32x32xf32> to vector<8x32xf32>
    %cst_55 = arith.constant dense<0.000000e+00> : vector<8x32xf32>
    %147 = tpu.matmul %145, %146, %cst_55 {dimension_numbers = #tpu.dot_dimension_numbers<[1], [0], [0], [1], [0, 0, 1, 1], [], []>} : vector<8x8xf32>, vector<8x32xf32>, vector<8x32xf32> -> vector<8x32xf32>
    %148 = arith.addf %127, %147 : vector<8x32xf32>
    %149 = vector.extract_strided_slice %11 {offsets = [8, 16], sizes = [8, 8], strides = [1, 1]} : vector<16x32xf32> to vector<8x8xf32>
    %150 = vector.extract_strided_slice %12 {offsets = [8, 16], sizes = [8, 8], strides = [1, 1]} : vector<16x32xf32> to vector<8x8xf32>
    %151 = vector.extract_strided_slice %13 {offsets = [8, 16], sizes = [8, 8], strides = [1, 1]} : vector<16x32xf32> to vector<8x8xf32>
    %cst_56 = arith.constant dense<0.000000e+00> : vector<8x8xf32>
    %152 = tpu.matmul %149, %150, %cst_56 {dimension_numbers = #tpu.dot_dimension_numbers<[1], [1], [0], [0], [0, 0, 1, 0], [], []>} : vector<8x8xf32>, vector<8x8xf32>, vector<8x8xf32> -> vector<8x8xf32>
    %cst_57 = arith.constant 0.353553385 : f32
    %153 = vector.broadcast %cst_57 : f32 to vector<8x8xf32>
    %154 = arith.mulf %152, %153 : vector<8x8xf32>
    %155 = arith.addf %154, %105 : vector<8x8xf32>
    %cst_58 = arith.constant dense<0xFF800000> : vector<8xf32>
    %156 = vector.multi_reduction <maximumf>, %155, %cst_58 [1] : vector<8x8xf32> to vector<8xf32>
    %157 = vector.shape_cast %156 : vector<8xf32> to vector<8x1xf32>
    %158 = vector.broadcast %157 : vector<8x1xf32> to vector<8x8xf32>
    %159 = arith.subf %155, %158 : vector<8x8xf32>
    %160 = math.exp %159 : vector<8x8xf32>
    %cst_59 = arith.constant dense<0.000000e+00> : vector<8xf32>
    %161 = vector.multi_reduction <add>, %160, %cst_59 [1] : vector<8x8xf32> to vector<8xf32>
    %162 = vector.shape_cast %161 : vector<8xf32> to vector<8x1xf32>
    %163 = tpu.reciprocal %162 {approx = true} : vector<8x1xf32> -> vector<8x1xf32>
    %164 = vector.broadcast %163 : vector<8x1xf32> to vector<8x8xf32>
    %165 = arith.mulf %160, %164 : vector<8x8xf32>
    %cst_60 = arith.constant dense<0.000000e+00> : vector<8x8xf32>
    %166 = tpu.matmul %165, %151, %cst_60 {dimension_numbers = #tpu.dot_dimension_numbers<[1], [0], [0], [1], [0, 0, 1, 1], [], []>} : vector<8x8xf32>, vector<8x8xf32>, vector<8x8xf32> -> vector<8x8xf32>
    %167 = vector.extract_strided_slice %15 {offsets = [16, 0], sizes = [8, 32], strides = [1, 1]} : vector<32x32xf32> to vector<8x32xf32>
    %cst_61 = arith.constant dense<0.000000e+00> : vector<8x32xf32>
    %168 = tpu.matmul %166, %167, %cst_61 {dimension_numbers = #tpu.dot_dimension_numbers<[1], [0], [0], [1], [0, 0, 1, 1], [], []>} : vector<8x8xf32>, vector<8x32xf32>, vector<8x32xf32> -> vector<8x32xf32>
    %169 = arith.addf %148, %168 : vector<8x32xf32>
    %170 = vector.extract_strided_slice %11 {offsets = [8, 24], sizes = [8, 8], strides = [1, 1]} : vector<16x32xf32> to vector<8x8xf32>
    %171 = vector.extract_strided_slice %12 {offsets = [8, 24], sizes = [8, 8], strides = [1, 1]} : vector<16x32xf32> to vector<8x8xf32>
    %172 = vector.extract_strided_slice %13 {offsets = [8, 24], sizes = [8, 8], strides = [1, 1]} : vector<16x32xf32> to vector<8x8xf32>
    %cst_62 = arith.constant dense<0.000000e+00> : vector<8x8xf32>
    %173 = tpu.matmul %170, %171, %cst_62 {dimension_numbers = #tpu.dot_dimension_numbers<[1], [1], [0], [0], [0, 0, 1, 0], [], []>} : vector<8x8xf32>, vector<8x8xf32>, vector<8x8xf32> -> vector<8x8xf32>
    %cst_63 = arith.constant 0.353553385 : f32
    %174 = vector.broadcast %cst_63 : f32 to vector<8x8xf32>
    %175 = arith.mulf %173, %174 : vector<8x8xf32>
    %176 = arith.addf %175, %105 : vector<8x8xf32>
    %cst_64 = arith.constant dense<0xFF800000> : vector<8xf32>
    %177 = vector.multi_reduction <maximumf>, %176, %cst_64 [1] : vector<8x8xf32> to vector<8xf32>
    %178 = vector.shape_cast %177 : vector<8xf32> to vector<8x1xf32>
    %179 = vector.broadcast %178 : vector<8x1xf32> to vector<8x8xf32>
    %180 = arith.subf %176, %179 : vector<8x8xf32>
    %181 = math.exp %180 : vector<8x8xf32>
    %cst_65 = arith.constant dense<0.000000e+00> : vector<8xf32>
    %182 = vector.multi_reduction <add>, %181, %cst_65 [1] : vector<8x8xf32> to vector<8xf32>
    %183 = vector.shape_cast %182 : vector<8xf32> to vector<8x1xf32>
    %184 = tpu.reciprocal %183 {approx = true} : vector<8x1xf32> -> vector<8x1xf32>
    %185 = vector.broadcast %184 : vector<8x1xf32> to vector<8x8xf32>
    %186 = arith.mulf %181, %185 : vector<8x8xf32>
    %cst_66 = arith.constant dense<0.000000e+00> : vector<8x8xf32>
    %187 = tpu.matmul %186, %172, %cst_66 {dimension_numbers = #tpu.dot_dimension_numbers<[1], [0], [0], [1], [0, 0, 1, 1], [], []>} : vector<8x8xf32>, vector<8x8xf32>, vector<8x8xf32> -> vector<8x8xf32>
    %188 = vector.extract_strided_slice %15 {offsets = [24, 0], sizes = [8, 32], strides = [1, 1]} : vector<32x32xf32> to vector<8x32xf32>
    %cst_67 = arith.constant dense<0.000000e+00> : vector<8x32xf32>
    %189 = tpu.matmul %187, %188, %cst_67 {dimension_numbers = #tpu.dot_dimension_numbers<[1], [0], [0], [1], [0, 0, 1, 1], [], []>} : vector<8x8xf32>, vector<8x32xf32>, vector<8x32xf32> -> vector<8x32xf32>
    %190 = arith.addf %169, %189 : vector<8x32xf32>
    %c8 = arith.constant 8 : index
    %c0_68 = arith.constant 0 : index
    %191 = vector.load %arg21[%c8, %c0_68] : memref<16x32xf32, #tpu.memory_space<vmem>>, vector<8x32xf32>
    tpu.vector_store %arg21[%c8, %c0_68], %190 {strides = array<i32>} : memref<16x32xf32, #tpu.memory_space<vmem>>, vector<8x32xf32>,
    %c0_69 = arith.constant 0 : index
    %c0_70 = arith.constant 0 : index
    %192 = vector.load %arg21[%c0_69, %c0_70] : memref<16x32xf32, #tpu.memory_space<vmem>>, vector<16x32xf32>
    %c0_71 = arith.constant 0 : index
    %c0_72 = arith.constant 0 : index
    %c0_73 = arith.constant 0 : index
    %193 = vector.load %arg8[%c0_71, %c0_72, %c0_73] : memref<1x1x32xf32, #tpu.memory_space<vmem>>, vector<1x1x32xf32>
    %194 = vector.shape_cast %193 : vector<1x1x32xf32> to vector<1x32xf32>
    %195 = vector.broadcast %194 : vector<1x32xf32> to vector<16x32xf32>
    %196 = arith.addf %192, %195 : vector<16x32xf32>
    %197 = arith.addf %196, %3 : vector<16x32xf32>
    %c0_74 = arith.constant 0 : index
    %c0_75 = arith.constant 0 : index
    %c0_76 = arith.constant 0 : index
    %198 = vector.load %arg9[%c0_74, %c0_75, %c0_76] : memref<1x1x32xf32, #tpu.memory_space<vmem>>, vector<1x1x32xf32>
    %199 = vector.shape_cast %198 : vector<1x1x32xf32> to vector<1x32xf32>
    %c0_77 = arith.constant 0 : index
    %c0_78 = arith.constant 0 : index
    %c0_79 = arith.constant 0 : index
    %200 = vector.load %arg10[%c0_77, %c0_78, %c0_79] : memref<1x1x32xf32, #tpu.memory_space<vmem>>, vector<1x1x32xf32>
    %201 = vector.shape_cast %200 : vector<1x1x32xf32> to vector<1x32xf32>
    %cst_80 = arith.constant dense<0.000000e+00> : vector<16xf32>
    %202 = vector.multi_reduction <add>, %197, %cst_80 [1] : vector<16x32xf32> to vector<16xf32>
    %203 = vector.shape_cast %202 : vector<16xf32> to vector<16x1xf32>
    %cst_81 = arith.constant 3.200000e+01 : f32
    %204 = vector.broadcast %cst_81 : f32 to vector<16x1xf32>
    %205 = arith.divf %203, %204 : vector<16x1xf32>
    %206 = vector.broadcast %205 : vector<16x1xf32> to vector<16x32xf32>
    %207 = arith.subf %197, %206 : vector<16x32xf32>
    %208 = arith.mulf %207, %207 : vector<16x32xf32>
    %cst_82 = arith.constant dense<0.000000e+00> : vector<16xf32>
    %209 = vector.multi_reduction <add>, %208, %cst_82 [1] : vector<16x32xf32> to vector<16xf32>
    %210 = vector.shape_cast %209 : vector<16xf32> to vector<16x1xf32>
    %cst_83 = arith.constant 3.200000e+01 : f32
    %211 = vector.broadcast %cst_83 : f32 to vector<16x1xf32>
    %212 = arith.divf %210, %211 : vector<16x1xf32>
    %cst_84 = arith.constant 9.99999996E-13 : f32
    %213 = vector.broadcast %cst_84 : f32 to vector<16x1xf32>
    %214 = arith.addf %212, %213 : vector<16x1xf32>
    %215 = math.rsqrt %214 : vector<16x1xf32>
    %216 = vector.broadcast %215 : vector<16x1xf32> to vector<16x32xf32>
    %217 = arith.mulf %207, %216 : vector<16x32xf32>
    %218 = vector.broadcast %199 : vector<1x32xf32> to vector<16x32xf32>
    %219 = arith.mulf %217, %218 : vector<16x32xf32>
    %220 = vector.broadcast %201 : vector<1x32xf32> to vector<16x32xf32>
    %221 = arith.addf %219, %220 : vector<16x32xf32>
    %c0_85 = arith.constant 0 : index
    %c0_86 = arith.constant 0 : index
    %c0_87 = arith.constant 0 : index
    %222 = vector.load %arg11[%c0_85, %c0_86, %c0_87] : memref<1x32x128xf32, #tpu.memory_space<vmem>>, vector<1x32x128xf32>
    %223 = vector.shape_cast %222 : vector<1x32x128xf32> to vector<32x128xf32>
    %cst_88 = arith.constant dense<0.000000e+00> : vector<16x128xf32>
    %224 = tpu.matmul %221, %223, %cst_88 {dimension_numbers = #tpu.dot_dimension_numbers<[1], [0], [0], [1], [0, 0, 1, 1], [], []>} : vector<16x32xf32>, vector<32x128xf32>, vector<16x128xf32> -> vector<16x128xf32>
    %c0_89 = arith.constant 0 : index
    %c0_90 = arith.constant 0 : index
    %c0_91 = arith.constant 0 : index
    %225 = vector.load %arg12[%c0_89, %c0_90, %c0_91] : memref<1x1x128xf32, #tpu.memory_space<vmem>>, vector<1x1x128xf32>
    %226 = vector.shape_cast %225 : vector<1x1x128xf32> to vector<1x128xf32>
    %227 = vector.broadcast %226 : vector<1x128xf32> to vector<16x128xf32>
    %228 = arith.addf %224, %227 : vector<16x128xf32>
    %229 = arith.mulf %228, %228 : vector<16x128xf32>
    %230 = arith.mulf %228, %229 : vector<16x128xf32>
    %cst_92 = arith.constant 4.471500e-02 : f32
    %231 = vector.broadcast %cst_92 : f32 to vector<16x128xf32>
    %232 = arith.mulf %231, %230 : vector<16x128xf32>
    %233 = arith.addf %228, %232 : vector<16x128xf32>
    %cst_93 = arith.constant 0.797884583 : f32
    %234 = vector.broadcast %cst_93 : f32 to vector<16x128xf32>
    %235 = arith.mulf %234, %233 : vector<16x128xf32>
    %236 = math.tanh %235 : vector<16x128xf32>
    %cst_94 = arith.constant 1.000000e+00 : f32
    %237 = vector.broadcast %cst_94 : f32 to vector<16x128xf32>
    %238 = arith.addf %237, %236 : vector<16x128xf32>
    %cst_95 = arith.constant 5.000000e-01 : f32
    %239 = vector.broadcast %cst_95 : f32 to vector<16x128xf32>
    %240 = arith.mulf %239, %238 : vector<16x128xf32>
    %241 = arith.mulf %228, %240 : vector<16x128xf32>
    %c0_96 = arith.constant 0 : index
    %c0_97 = arith.constant 0 : index
    %c0_98 = arith.constant 0 : index
    %242 = vector.load %arg13[%c0_96, %c0_97, %c0_98] : memref<1x128x32xf32, #tpu.memory_space<vmem>>, vector<1x128x32xf32>
    %243 = vector.shape_cast %242 : vector<1x128x32xf32> to vector<128x32xf32>
    %cst_99 = arith.constant dense<0.000000e+00> : vector<16x32xf32>
    %244 = tpu.matmul %241, %243, %cst_99 {dimension_numbers = #tpu.dot_dimension_numbers<[1], [0], [0], [1], [0, 0, 1, 1], [], []>} : vector<16x128xf32>, vector<128x32xf32>, vector<16x32xf32> -> vector<16x32xf32>
    %c0_100 = arith.constant 0 : index
    %c0_101 = arith.constant 0 : index
    %c0_102 = arith.constant 0 : index
    %245 = vector.load %arg14[%c0_100, %c0_101, %c0_102] : memref<1x1x32xf32, #tpu.memory_space<vmem>>, vector<1x1x32xf32>
    %246 = vector.shape_cast %245 : vector<1x1x32xf32> to vector<1x32xf32>
    %247 = vector.broadcast %246 : vector<1x32xf32> to vector<16x32xf32>
    %248 = arith.addf %244, %247 : vector<16x32xf32>
    %249 = arith.addf %248, %221 : vector<16x32xf32>
    %c0_103 = arith.constant 0 : index
    %c0_104 = arith.constant 0 : index
    %c0_105 = arith.constant 0 : index
    %250 = vector.load %arg15[%c0_103, %c0_104, %c0_105] : memref<1x1x32xf32, #tpu.memory_space<vmem>>, vector<1x1x32xf32>
    %251 = vector.shape_cast %250 : vector<1x1x32xf32> to vector<1x32xf32>
    %c0_106 = arith.constant 0 : index
    %c0_107 = arith.constant 0 : index
    %c0_108 = arith.constant 0 : index
    %252 = vector.load %arg16[%c0_106, %c0_107, %c0_108] : memref<1x1x32xf32, #tpu.memory_space<vmem>>, vector<1x1x32xf32>
    %253 = vector.shape_cast %252 : vector<1x1x32xf32> to vector<1x32xf32>
    %cst_109 = arith.constant dense<0.000000e+00> : vector<16xf32>
    %254 = vector.multi_reduction <add>, %249, %cst_109 [1] : vector<16x32xf32> to vector<16xf32>
    %255 = vector.shape_cast %254 : vector<16xf32> to vector<16x1xf32>
    %cst_110 = arith.constant 3.200000e+01 : f32
    %256 = vector.broadcast %cst_110 : f32 to vector<16x1xf32>
    %257 = arith.divf %255, %256 : vector<16x1xf32>
    %258 = vector.broadcast %257 : vector<16x1xf32> to vector<16x32xf32>
    %259 = arith.subf %249, %258 : vector<16x32xf32>
    %260 = arith.mulf %259, %259 : vector<16x32xf32>
    %cst_111 = arith.constant dense<0.000000e+00> : vector<16xf32>
    %261 = vector.multi_reduction <add>, %260, %cst_111 [1] : vector<16x32xf32> to vector<16xf32>
    %262 = vector.shape_cast %261 : vector<16xf32> to vector<16x1xf32>
    %cst_112 = arith.constant 3.200000e+01 : f32
    %263 = vector.broadcast %cst_112 : f32 to vector<16x1xf32>
    %264 = arith.divf %262, %263 : vector<16x1xf32>
    %cst_113 = arith.constant 9.99999996E-13 : f32
    %265 = vector.broadcast %cst_113 : f32 to vector<16x1xf32>
    %266 = arith.addf %264, %265 : vector<16x1xf32>
    %267 = math.rsqrt %266 : vector<16x1xf32>
    %268 = vector.broadcast %267 : vector<16x1xf32> to vector<16x32xf32>
    %269 = arith.mulf %259, %268 : vector<16x32xf32>
    %270 = vector.broadcast %251 : vector<1x32xf32> to vector<16x32xf32>
    %271 = arith.mulf %269, %270 : vector<16x32xf32>
    %272 = vector.broadcast %253 : vector<1x32xf32> to vector<16x32xf32>
    %273 = arith.addf %271, %272 : vector<16x32xf32>
    %c0_114 = arith.constant 0 : index
    %c0_115 = arith.constant 0 : index
    %274 = vector.load %arg20[%c0_114, %c0_115] : memref<16x32xf32, #tpu.memory_space<vmem>>, vector<16x32xf32>
    tpu.vector_store %arg20[%c0_114, %c0_115], %273 {strides = array<i32>} : memref<16x32xf32, #tpu.memory_space<vmem>>, vector<16x32xf32>,
    %c1_i32 = arith.constant 1 : i32
    %275 = arith.cmpi eq, %arg0, %c1_i32 : i32
    %276 = arith.extui %275 : i1 to i32
    %c0_i32_116 = arith.constant 0 : i32
    %277 = arith.cmpi ne, %276, %c0_i32_116 : i32
    scf.if %277 {
      %cst_117 = arith.constant 0.000000e+00 : f32
      %278 = vector.broadcast %cst_117 : f32 to vector<16x32xf32>
      %279 = arith.maximumf %273, %278 : vector<16x32xf32>
      %c0_118 = arith.constant 0 : index
      %c0_119 = arith.constant 0 : index
      %280 = vector.load %arg17[%c0_118, %c0_119] : memref<32x128xf32, #tpu.memory_space<vmem>>, vector<32x128xf32>
      %cst_120 = arith.constant dense<0.000000e+00> : vector<16x128xf32>
      %281 = tpu.matmul %279, %280, %cst_120 {dimension_numbers = #tpu.dot_dimension_numbers<[1], [0], [0], [1], [0, 0, 1, 1], [], []>} : vector<16x32xf32>, vector<32x128xf32>, vector<16x128xf32> -> vector<16x128xf32>
      %c0_121 = arith.constant 0 : index
      %c0_122 = arith.constant 0 : index
      %282 = vector.load %arg18[%c0_121, %c0_122] : memref<1x128xf32, #tpu.memory_space<vmem>>, vector<1x128xf32>
      %283 = vector.broadcast %282 : vector<1x128xf32> to vector<16x128xf32>
      %284 = arith.addf %281, %283 : vector<16x128xf32>
      %c0_123 = arith.constant 0 : index
      %c0_124 = arith.constant 0 : index
      %285 = vector.load %arg19[%c0_123, %c0_124] : memref<16x128xf32, #tpu.memory_space<vmem>>, vector<16x128xf32>
      tpu.vector_store %arg19[%c0_123, %c0_124], %284 {strides = array<i32>} : memref<16x128xf32, #tpu.memory_space<vmem>>, vector<16x128xf32>,
    } else {
    }
    return
  }
  func.func @transform_0(%arg0: i32) -> (i32, i32) {
    %c0_i32 = arith.constant 0 : i32
    %c0_i32_0 = arith.constant 0 : i32
    %c0_i32_1 = arith.constant 0 : i32
    return %c0_i32, %c0_i32_0 : i32, i32
  }
  func.func @transform_1(%arg0: i32) -> (i32, i32, i32) {
    %c0_i32 = arith.constant 0 : i32
    %c0_i32_0 = arith.constant 0 : i32
    %c0_i32_1 = arith.constant 0 : i32
    %c0_i32_2 = arith.constant 0 : i32
    return %c0_i32, %c0_i32_0, %c0_i32_1 : i32, i32, i32
  }
  func.func @transform_2(%arg0: i32) -> (i32, i32) {
    %c0_i32 = arith.constant 0 : i32
    %c0_i32_0 = arith.constant 0 : i32
    %c0_i32_1 = arith.constant 0 : i32
    return %c0_i32, %c0_i32_0 : i32, i32
  }
  func.func @transform_3(%arg0: i32) -> (i32, i32) {
    %c0_i32 = arith.constant 0 : i32
    %c0_i32_0 = arith.constant 0 : i32
    %c0_i32_1 = arith.constant 0 : i32
    return %c0_i32, %c0_i32_0 : i32, i32
  }
  func.func @transform_4(%arg0: i32) -> (i32, i32, i32) {
    %c0_i32 = arith.constant 0 : i32
    %c0_i32_0 = arith.constant 0 : i32
    %c0_i32_1 = arith.constant 0 : i32
    return %arg0, %c0_i32, %c0_i32_0 : i32, i32, i32
  }
  func.func @transform_5(%arg0: i32) -> (i32, i32, i32) {
    %c0_i32 = arith.constant 0 : i32
    %c0_i32_0 = arith.constant 0 : i32
    %c0_i32_1 = arith.constant 0 : i32
    return %arg0, %c0_i32, %c0_i32_0 : i32, i32, i32
  }
  func.func @transform_6(%arg0: i32) -> (i32, i32, i32) {
    %c0_i32 = arith.constant 0 : i32
    %c0_i32_0 = arith.constant 0 : i32
    %c0_i32_1 = arith.constant 0 : i32
    return %arg0, %c0_i32, %c0_i32_0 : i32, i32, i32
  }
  func.func @transform_7(%arg0: i32) -> (i32, i32, i32) {
    %c0_i32 = arith.constant 0 : i32
    %c0_i32_0 = arith.constant 0 : i32
    %c0_i32_1 = arith.constant 0 : i32
    return %arg0, %c0_i32, %c0_i32_0 : i32, i32, i32
  }
  func.func @transform_8(%arg0: i32) -> (i32, i32, i32) {
    %c0_i32 = arith.constant 0 : i32
    %c0_i32_0 = arith.constant 0 : i32
    %c0_i32_1 = arith.constant 0 : i32
    return %arg0, %c0_i32, %c0_i32_0 : i32, i32, i32
  }
  func.func @transform_9(%arg0: i32) -> (i32, i32, i32) {
    %c0_i32 = arith.constant 0 : i32
    %c0_i32_0 = arith.constant 0 : i32
    %c0_i32_1 = arith.constant 0 : i32
    return %arg0, %c0_i32, %c0_i32_0 : i32, i32, i32
  }
  func.func @transform_10(%arg0: i32) -> (i32, i32, i32) {
    %c0_i32 = arith.constant 0 : i32
    %c0_i32_0 = arith.constant 0 : i32
    %c0_i32_1 = arith.constant 0 : i32
    return %arg0, %c0_i32, %c0_i32_0 : i32, i32, i32
  }
  func.func @transform_11(%arg0: i32) -> (i32, i32, i32) {
    %c0_i32 = arith.constant 0 : i32
    %c0_i32_0 = arith.constant 0 : i32
    %c0_i32_1 = arith.constant 0 : i32
    return %arg0, %c0_i32, %c0_i32_0 : i32, i32, i32
  }
  func.func @transform_12(%arg0: i32) -> (i32, i32, i32) {
    %c0_i32 = arith.constant 0 : i32
    %c0_i32_0 = arith.constant 0 : i32
    %c0_i32_1 = arith.constant 0 : i32
    return %arg0, %c0_i32, %c0_i32_0 : i32, i32, i32
  }
  func.func @transform_13(%arg0: i32) -> (i32, i32, i32) {
    %c0_i32 = arith.constant 0 : i32
    %c0_i32_0 = arith.constant 0 : i32
    %c0_i32_1 = arith.constant 0 : i32
    return %arg0, %c0_i32, %c0_i32_0 : i32, i32, i32
  }
  func.func @transform_14(%arg0: i32) -> (i32, i32, i32) {
    %c0_i32 = arith.constant 0 : i32
    %c0_i32_0 = arith.constant 0 : i32
    %c0_i32_1 = arith.constant 0 : i32
    return %arg0, %c0_i32, %c0_i32_0 : i32, i32, i32
  }
  func.func @transform_15(%arg0: i32) -> (i32, i32, i32) {
    %c0_i32 = arith.constant 0 : i32
    %c0_i32_0 = arith.constant 0 : i32
    %c0_i32_1 = arith.constant 0 : i32
    return %arg0, %c0_i32, %c0_i32_0 : i32, i32, i32
  }
  func.func @transform_16(%arg0: i32) -> (i32, i32) {
    %c0_i32 = arith.constant 0 : i32
    %c0_i32_0 = arith.constant 0 : i32
    %c0_i32_1 = arith.constant 0 : i32
    return %c0_i32, %c0_i32_0 : i32, i32
  }
  func.func @transform_17(%arg0: i32) -> (i32, i32) {
    %c0_i32 = arith.constant 0 : i32
    %c0_i32_0 = arith.constant 0 : i32
    %c0_i32_1 = arith.constant 0 : i32
    return %c0_i32, %c0_i32_0 : i32, i32
  }
  func.func @transform_18(%arg0: i32) -> (i32, i32) {
    %c0_i32 = arith.constant 0 : i32
    %c0_i32_0 = arith.constant 0 : i32
    %c0_i32_1 = arith.constant 0 : i32
    return %c0_i32, %c0_i32_0 : i32, i32
  }
}

</mosaic_0001>

<bundles_post_ra>
// kernel: _lambda_.1
= control target key start
LH: loop header
LB: loop body
LE: loop exit
PB: predicated region body
PF: predicated region fallthrough
CT: control target
= control target key end

     0   :  { %s4921_s0 = inlined_call_operand.vmem [shape: f32[16,32], index: 0, kind: input, shape index: {}]   ;;  %s4922_s1 = inlined_call_operand.vmem [shape: f32[2,8,8], index: 1, kind: input, shape index: {}]   ;;  %s4923_s2 = inlined_call_operand.vmem [shape: f32[1,32], index: 2, kind: input, shape index: {}]   ;;  %s4924_s3 = inlined_call_operand.vmem [shape: f32[1,32], index: 3, kind: input, shape index: {}]   ;;  %s4925_s4 = inlined_call_operand.hbm [shape: f32[2,32,96], index: 4, kind: input, shape index: {}]   ;;  %s4926_s5 = inlined_call_operand.vmem [shape: f32[2,1,96], index: 5, kind: input, shape index: {}]   ;;  %s4927_s6 = inlined_call_operand.hbm [shape: f32[2,32,32], index: 6, kind: input, shape index: {}]   ;;  %s4928_s7 = inlined_call_operand.vmem [shape: f32[2,1,32], index: 7, kind: input, shape index: {}, may-alias: {7,9,13,15}]   ;;  %s4929_s8 = inlined_call_operand.vmem [shape: f32[2,1,32], index: 8, kind: input, shape index: {}, may-alias: {8,14}]   ;;  %s4930_s9 = inlined_call_operand.vmem [shape: f32[2,1,32], index: 9, kind: input, shape index: {}, may-alias: {7,9,13,15}]   ;;  %s4931_s10 = inlined_call_operand.hbm [shape: f32[2,32,128], index: 10, kind: input, shape index: {}]   ;;  %s4932_s11 = inlined_call_operand.vmem [shape: f32[2,1,128], index: 11, kind: input, shape index: {}]   ;;  %s4933_s12 = inlined_call_operand.vmem [shape: f32[2,128,32], index: 12, kind: input, shape index: {}]   ;;  %s4934_s13 = inlined_call_operand.vmem [shape: f32[2,1,32], index: 13, kind: input, shape index: {}, may-alias: {7,9,13,15}]   ;;  %s4935_s14 = inlined_call_operand.vmem [shape: f32[2,1,32], index: 14, kind: input, shape index: {}, may-alias: {8,14}]   ;;  %s4936_s15 = inlined_call_operand.vmem [shape: f32[2,1,32], index: 15, kind: input, shape index: {}, may-alias: {7,9,13,15}]   ;;  %s4937_s16 = inlined_call_operand.hbm [shape: f32[32,128], index: 16, kind: input, shape index: {}]   ;;  %s4938_s17 = inlined_call_operand.vmem [shape: f32[1,128], index: 17, kind: input, shape index: {}]   ;;  %s4939_s18 = inlined_call_operand.vmem [shape: f32[16,128], index: 18, kind: output, shape index: {}]  }
   0x1   :  { %4958 = sst [smem:[#allocation17_spill]] %s4921_s0 }
   0x2   :  { %4959 = sst [smem:[#allocation18_spill]] %s4922_s1 }
   0x3   :  { %4960 = sst [smem:[#allocation19_spill]] %s4923_s2 }
   0x4   :  { %4961 = sst [smem:[#allocation20_spill]] %s4924_s3 }
   0x5   :  { %4962 = sst [smem:[#allocation21_spill]] %s4925_s4 }
   0x6   :  { %4963 = sst [smem:[#allocation22_spill]] %s4927_s6 }
   0x7   :  { %4964 = sst [smem:[#allocation23_spill]] %s4931_s10 }
   0x8   :  { %4965 = sst [smem:[#allocation24_spill]] %s4934_s13 }
   0x9   :  { %4966 = sst [smem:[#allocation25_spill]] %s4935_s14 }
   0xa   :  { %4967 = sst [smem:[#allocation26_spill]] %s4936_s15 }
   0xb   :  { %4968 = sst [smem:[#allocation27_spill]] %s4937_s16 }
   0xc   :  { %4969 = sst [smem:[#allocation28_spill]] %s4938_s17 }
   0xd   :  { %4970 = sst [smem:[#allocation29_spill]] %s4939_s18 }
   0xe   :  { %23 = vsyncpa [#allocation5], 0 }
   0xf   :  { %25 = vsyncpa [#allocation5 + $0x1], 0 }
  0x10   :  { %26 = vsyncpa [#allocation7], 0 }
  0x11   :  { %28 = vsyncpa [#allocation7 + $0x1], 0 }
  0x12   :  { %29 = vsyncpa [#allocation10], 0  ;;  %s4292_s27 = smov 0   ;;  %s4294_s28 = smov 0  }
  0x13   :  { %s4296_s29 = smov 0   ;;  %s4298_s30 = smov 0  }
  0x14 LB: > { %4971 = sst [smem:[#allocation14_spill]] %s4172_s29  ;;  %s4313_s0 = sadd.s32 1, %s4176_s30   ;;  %s4176_s30 = sphi %s4298_s30, %s5010_s30   ;;  %s4172_s29 = sphi %s4296_s29, %s5012_s29   ;;  %s4168_s28 = sphi %s4294_s28, %s5014_s28   ;;  %s4164_s27 = sphi %s4292_s27, %s5013_s27  }
  0x15   : > { %4972 = sst [smem:[#allocation15_spill]] %s4313_s0  ;;  %s126_s19 = sadd.s32 1, %s4172_s29 }
  0x16   : > { %s123_s1 = ssub.s32 %s4176_s30, %s4313_s0  ;;  %p133_p0 = scmp.ne.s32.totalorder %s4172_s29, %s4168_s28 }
  0x17   : > { %p124_p1 = scmp.eq.s32.totalorder %s123_s1, 0  ;;  %p134_p2 = scmp.eq.s32.totalorder %s4176_s30, 0 }
  0x18   : > { %p3918_p4 = scmp.lt.s32.totalorder %s4176_s30, 2  ;;  %s4942_s21 = sand.u32 1, %s4172_s29  }
  0x19   : > { %s4322_s20 = scalar_select %p124_p1, %s4172_s29, %s126_s19  }
  0x1a   : > { %p135_p3 = por %p134_p2, %p133_p0  ;;  %s4328_s22 = sshll.u32 %s4942_s21, 5 }
  0x1b   : > { %4973 = sst [smem:[#allocation16_spill]] %s4322_s20  ;;  %s4331_s2 = sshll.u32 %s4176_s30, 9 }
  0x1c   : > { %p4333_p5 = pnand %p3918_p4, %p135_p3  ;;  %s567_s24 = sand.u32 1, %s4176_s30  }
  0x1d   : > { %s4975_s6 = sld [smem:[#allocation22_spill]]  ;;  %s571_s1 = scalar_lea.vmem [#allocation6], %s4328_s22 }
  0x1e   : > { %s4974_s23 = scalar_select %p4333_p5, 1, 0 }
  0x1f   : > { %s578_s21 = sshll.u32 %s571_s1, 4  ;;  %s4347_s20 = scalar_lea.sflag [#allocation7], %s567_s24  ;;  %s4345_s21 = int_to_ptr.vmem [resolvable:$true] %s578_s21 }
  0x20   : > { %p4353_p7 = pneg %p4333_p5 }
  0x22   : > { %s4976_s18 = scalar_select %p4353_p7, 1, 0 }
  0x23   : > { %s4342_s19 = scalar_lea.hbm %s4975_s6, %s4331_s2  ;;  %s4021_s17 = scalar_lea.hbm %s4975_s6, 1024 }
  0x24   : > { %s4016_s0 = scalar_lea.hbm %s4342_s19, 512  ;;  %p4022_p10 = scmp.lt.u32.totalorder %s4342_s19, %s4975_s6 }
  0x25   : > { %p4017_p6 = scmp.ne.s32.totalorder %s4342_s19, %s4016_s0  ;;  %p4023_p11 = scmp.lt.u32.totalorder %s4021_s17, %s4016_s0 }
  0x26   : > { %p4025_p13 = scmp.lt.u32.totalorder %s4016_s0, %s4342_s19 }
  0x27   : > { %p4019_p8 = pnand %p4353_p7, %p4017_p6  ;;  %p4024_p12 = por %p4023_p11, %p4022_p10 }
  0x29   : > { %p4020_p9 = pneg %p4019_p8  ;;  %p4026_p0 = por %p4025_p13, %p4024_p12 }
  0x2b   : > { %p4027_p1 = pnand %p4026_p0, %p4020_p9 }
  0x2d   : > { %4030 = shalt.err (!%p4027_p1)
}
  0x2e   : > { %s4031_s24 = scalar_lea.vmem %s4345_s21, 512  ;;  %s4178_s25 = smov [#allocation6]  }
  0x2f   : > { %p4032_p2 = scmp.ne.s32.totalorder %s4345_s21, %s4031_s24  ;;  %s4036_s26 = sshll.u32 %s4178_s25, 4  ;;  %s4037_s26 = int_to_ptr.vmem [resolvable:$false] %s4036_s26 }
  0x30   : > { %s4038_s3 = scalar_lea.vmem %s4037_s26, 1024  ;;  %p4039_p6 = scmp.lt.s32.totalorder %s4345_s21, %s4037_s26 }
  0x31   : > { %p4034_p3 = pnand %p4032_p2, %p4353_p7  ;;  %p4040_p8 = scmp.lt.s32.totalorder %s4038_s3, %s4031_s24 }
  0x33   : > { %p4035_p4 = pneg %p4034_p3  ;;  %p4041_p10 = por %p4040_p8, %p4039_p6 }
  0x35   : > { %p4042_p11 = pnand %p4041_p10, %p4035_p4 }
  0x37   : > { %4045 = shalt.err (!%p4042_p11)
}
  0x38   : > { %s4946_s17 = smov 128   ;;  %s4948_s0 = smov 8  }
  0x39   : > { %3913 = dma.hbm_to_vmem [thread:$0]  (!%p4333_p5), %s4342_s19, 512, %s4345_s21, %s4347_s20, %s4946_s17, %s4946_s17, %s4948_s0  }
  0x3a   : > { %s4381_s1 = sadd.s32 4294967295, %s4176_s30   ;;  %p139_p9 = scmp.ne.s32.totalorder %s4168_s28, %s4164_s27 }
  0x3b   : > { %p4950_p12 = scmp.eq.s32.totalorder %s4381_s1, 0  ;;  %p3477_p13 = scmp.ge.s32.totalorder %s4176_s30, 1 }
  0x3c   : > { %p499_p0 = scmp.lt.s32.totalorder %s4176_s30, 3  ;;  %s4181_s19 = smov [#allocation9]  }
  0x3d   : > { %p4391_p2 = por %p4950_p12, %p139_p9  ;;  %s523_s25 = sshll.u32 %s4181_s19, 4  ;;  %s4399_s25 = int_to_ptr.vmem [resolvable:$true] %s523_s25 }
  0x3e   : > { %p4395_p3 = pnand %p3477_p13, %p499_p0  ;;  %s4979_s4 = sld [smem:[#allocation21_spill]] }
  0x3f   : > { %s4977_s24 = scalar_select %p4391_p2, 1, 0 }
  0x40   : > { %s4978_s21 = scalar_select %p4395_p3, 1, 0 }
  0x41   : > { %p3903_p4 = pneg %p4395_p3  ;;  %s544_s3 = scalar_lea.vmem [#allocation4], %s4328_s22 }
  0x42   : > { %s551_s17 = sshll.u32 %s544_s3, 4  ;;  %s4981_s19 = sand.u32 1, %s4172_s29   ;;  %s4416_s17 = int_to_ptr.vmem [resolvable:$true] %s551_s17 }
  0x43   : > { %p4412_p6 = pnand %p3903_p4, %p4950_p12  ;;  %s4420_s6 = scalar_lea.sflag [#allocation5], %s4981_s19 }
  0x44   : > { %s4407_s26 = scalar_lea.hbm %s4979_s4, %s4331_s2  ;;  %s4051_s14 = scalar_lea.hbm %s4979_s4, 1024 }
  0x45   : > { %s4980_s0 = scalar_select %p4412_p6, 1, 0 }
  0x46   : > { %s4046_s15 = scalar_lea.hbm %s4407_s26, 512  ;;  %p4052_p9 = scmp.lt.u32.totalorder %s4407_s26, %s4979_s4 }
  0x47   : > { %p4047_p8 = scmp.ne.s32.totalorder %s4407_s26, %s4046_s15  ;;  %p4053_p13 = scmp.lt.u32.totalorder %s4051_s14, %s4046_s15 }
  0x48   : > { %p4055_p4 = scmp.lt.u32.totalorder %s4046_s15, %s4407_s26 }
  0x49   : > { %p4049_p10 = pnand %p4047_p8, %p4353_p7  ;;  %p4054_p0 = por %p4053_p13, %p4052_p9 }
  0x4b   : > { %p4050_p11 = pneg %p4049_p10  ;;  %p4056_p1 = por %p4055_p4, %p4054_p0 }
  0x4d   : > { %p4057_p12 = pnand %p4056_p1, %p4050_p11 }
  0x4f   : > { %4060 = shalt.err (!%p4057_p12)
}
  0x50   : > { %s4061_s19 = scalar_lea.vmem %s4416_s17, 512  ;;  %s4182_s27 = smov [#allocation4]  }
  0x51   : > { %p4062_p8 = scmp.ne.s32.totalorder %s4416_s17, %s4061_s19  ;;  %s4066_s30 = sshll.u32 %s4182_s27, 4  ;;  %s4067_s30 = int_to_ptr.vmem [resolvable:$false] %s4066_s30 }
  0x52   : > { %s4068_s13 = scalar_lea.vmem %s4067_s30, 1024  ;;  %p4069_p3 = scmp.lt.s32.totalorder %s4416_s17, %s4067_s30 }
  0x53   : > { %p4064_p10 = pnand %p4062_p8, %p4353_p7  ;;  %p4070_p6 = scmp.lt.s32.totalorder %s4068_s13, %s4061_s19 }
  0x55   : > { %p4065_p2 = pneg %p4064_p10  ;;  %p4071_p9 = por %p4070_p6, %p4069_p3 }
  0x57   : > { %p4072_p13 = pnand %p4071_p9, %p4065_p2 }
  0x59   : > { %4075 = shalt.err (!%p4072_p13)
}
  0x5a   : > { %s4982_s14 = smov 8   ;;  %s4983_s15 = smov 128  }
  0x5b   : > { %3910 = dma.hbm_to_vmem [thread:$0]  (!%p4333_p5), %s4407_s26, 512, %s4416_s17, %s4420_s6, %s4983_s15, %s4983_s15, %s4982_s14  }
  0x5c   : > { %s4984_s16 = sld [smem:[#allocation27_spill]]  ;;  %p4985_p1 = scmp.ne.s32.totalorder %s4980_s0, 0 }
  0x5e   : > { %p4078_p2 = pneg %p4985_p1 }
  0x62   : > { %s4076_s27 = scalar_lea.hbm %s4984_s16, 512 }
  0x63   : > { %p4077_p12 = scmp.ne.s32.totalorder %s4984_s16, %s4076_s27  ;;  %p4083_p11 = scmp.lt.u32.totalorder %s4076_s27, %s4984_s16 }
  0x65   : > { %p4079_p3 = pnand %p4078_p2, %p4077_p12 }
  0x67   : > { %p4080_p6 = pneg %p4079_p3 }
  0x69   : > { %p4085_p0 = pnand %p4083_p11, %p4080_p6 }
  0x6b   : > { %4088 = shalt.err (!%p4085_p0)
}
  0x6c   : > { %s4089_s6 = scalar_lea.vmem %s4399_s25, 512  ;;  %p4097_p9 = scmp.lt.s32.totalorder %s4399_s25, %s4399_s25 }
  0x6d   : > { %p4090_p4 = scmp.ne.s32.totalorder %s4399_s25, %s4089_s6  ;;  %p4098_p13 = scmp.lt.s32.totalorder %s4089_s6, %s4089_s6 }
  0x6f   : > { %p4092_p8 = pnand %p4090_p4, %p4078_p2  ;;  %p4099_p5 = por %p4098_p13, %p4097_p9 }
  0x71   : > { %p4093_p10 = pneg %p4092_p8 }
  0x73   : > { %p4100_p7 = pnand %p4099_p5, %p4093_p10 }
  0x75   : > { %4103 = shalt.err (!%p4100_p7)
}
  0x76   : > { %3906 = dma.hbm_to_vmem [thread:$0]  (!%p4985_p1), %s4984_s16, 512, %s4399_s25, [#allocation10], %s4983_s15, %s4983_s15, %s4982_s14  }
  0x77   : > { %s4986_s10 = sld [smem:[#allocation23_spill]]  ;;  %s610_s0 = scalar_lea.vmem [#allocation8], %s4328_s22 }
  0x78   : > { %s617_s27 = sshll.u32 %s610_s0, 4  ;;  %p4987_p7 = scmp.ne.s32.totalorder %s4976_s18, 0  ;;  %s4478_s27 = int_to_ptr.vmem [resolvable:$true] %s617_s27 }
  0x7d   : > { %s4475_s3 = scalar_lea.hbm %s4986_s10, %s4331_s2  ;;  %s4109_s13 = scalar_lea.hbm %s4986_s10, 1024 }
  0x7e   : > { %s4104_s30 = scalar_lea.hbm %s4475_s3, 512  ;;  %p4110_p1 = scmp.lt.u32.totalorder %s4475_s3, %s4986_s10 }
  0x7f   : > { %p4105_p5 = scmp.ne.s32.totalorder %s4475_s3, %s4104_s30  ;;  %p4111_p3 = scmp.lt.u32.totalorder %s4109_s13, %s4104_s30 }
  0x80   : > { %p4113_p11 = scmp.lt.u32.totalorder %s4104_s30, %s4475_s3 }
  0x81   : > { %p4107_p12 = pnand %p4105_p5, %p4987_p7  ;;  %p4112_p6 = por %p4111_p3, %p4110_p1 }
  0x83   : > { %p4108_p2 = pneg %p4107_p12  ;;  %p4114_p0 = por %p4113_p11, %p4112_p6 }
  0x85   : > { %p4115_p4 = pnand %p4114_p0, %p4108_p2 }
  0x87   : > { %4118 = shalt.err (!%p4115_p4)
}
  0x88   : > { %s4119_s22 = scalar_lea.vmem %s4478_s27, 512  ;;  %s4183_s4 = smov [#allocation8]  }
  0x89   : > { %p4120_p8 = scmp.ne.s32.totalorder %s4478_s27, %s4119_s22  ;;  %s4124_s29 = sshll.u32 %s4183_s4, 4  ;;  %s4125_s29 = int_to_ptr.vmem [resolvable:$false] %s4124_s29 }
  0x8a   : > { %s4126_s17 = scalar_lea.vmem %s4125_s29, 1024  ;;  %p4127_p13 = scmp.lt.s32.totalorder %s4478_s27, %s4125_s29 }
  0x8b   : > { %p4122_p10 = pnand %p4120_p8, %p4987_p7  ;;  %p4128_p5 = scmp.lt.s32.totalorder %s4126_s17, %s4119_s22 }
  0x8d   : > { %p4123_p9 = pneg %p4122_p10  ;;  %p4129_p12 = por %p4128_p5, %p4127_p13 }
  0x8f   : > { %p4130_p1 = pnand %p4129_p12, %p4123_p9 }
  0x91   : > { %4133 = shalt.err (!%p4130_p1)
}
  0x92   : > { %p4988_p2 = scmp.ne.s32.totalorder %s4974_s23, 0  ;;  %p4989_p7 = scmp.ne.s32.totalorder %s4978_s21, 0 }
  0x93   : > { %s663_s18 = sand.u32 (!%p4989_p7), 1, %s4168_s28   ;;  %p4990_p3 = scmp.ne.s32.totalorder (!%p4989_p7), %s4977_s24, 0 }
  0x94   : > { %3916 = dma.hbm_to_vmem [thread:$0]  (!%p4988_p2), %s4475_s3, 512, %s4478_s27, %s4347_s20, %s4983_s15, %s4983_s15, %s4982_s14  }
  0x95   : > { %661 = sbr.rel (%p4989_p7) target bundleno = 6740 (0x1a54), region = 92  ;;  %s3490_s26 = sshll.u32 (!%p4989_p7), %s663_s18, 5 }
  0x96   : > { %s664_s0 = scalar_lea.sflag (!%p4989_p7), [#allocation5], %s663_s18  ;;  %s4508_s30 = scalar_lea.vmem (!%p4989_p7), [#allocation4], %s3490_s26 }
  0x9c   : > { %4151 = dma.done.wait (%p4990_p3), %s664_s0, 512  }
  0x9d   : > { %4153 = vsyncadd (%p4990_p3), %s664_s0, 4294966784  ;;  %s672_s23 = sand.u32 1, %s4381_s1   ;;  %s4515_s20 = scalar_lea.vmem [#allocation6], %s3490_s26 }
  0x9e   : > { %s673_s19 = scalar_lea.sflag [#allocation7], %s672_s23 }
  0x9f   : > { %4155 = dma.done.wait (%p4990_p3), %s673_s19, 1024  }
  0xa0   : > { %4157 = vsyncadd (%p4990_p3), %s673_s19, 4294966272  ;;  %s4521_s21 = scalar_lea.vmem [#allocation8], %s3490_s26  ;;  %p4991_p6 = scmp.eq.s32.totalorder %s4381_s1, 0 }
  0xa2   : > { %4159 = dma.done.wait (%p4991_p6), [#allocation10], 512   ;;  %p4992_p11 = pmov %p4991_p6 }
  0xa3   : > { %p776_p0 = scmp.lt.s32.totalorder %s4381_s1, 1  ;;  %s4993_s13 = sld [smem:[#allocation24_spill]] }
  0xa4   : > { %4161 = vsyncadd (%p4992_p11), [#allocation10], 4294966784  ;;  %s4994_s22 = sld [smem:[#allocation25_spill]]  ;;  %s4995_s17 = sld [smem:[#allocation26_spill]] }
  0xa5   : > { %s4529_s14 = scalar_select %p776_p0, %s4381_s1, 1 }
  0xa6   : > { %p4996_p4 = scmp.ne.s32.totalorder %s4381_s1, 0 }
  0xa7   : > { %s790_s0 = scalar_lea.vmem %s4932_s11, %s4529_s14  ;;  %s3553_s23 = sshll.u32 %s4529_s14, 7  ;;  %vm813_vm0 = vcmask (!%p4996_p4), 261120  }
  0xa8   : > { %s4555_s3 = scalar_lea.vmem %s4933_s12, %s3553_s23  ;;  %808 = sbr.rel (%p4996_p4) target bundleno = 494 (0x1ee), region = 112 }
  0xa9   : > { %s798_s24 = scalar_lea.vmem %s4993_s13, %s4529_s14  ;;  %s4997_s19 = sld [smem:[#allocation17_spill]] (!%p4996_p4) }
  0xaa   : > { %s801_s10 = scalar_lea.vmem %s4994_s22, %s4529_s14  ;;  %s804_s16 = scalar_lea.vmem %s4995_s17, %s4529_s14 }
  0xab   : > { %s4998_s17 = sld [smem:[#allocation19_spill]] (!%p4996_p4)  ;;  %s4999_s6 = sld [smem:[#allocation20_spill]] (!%p4996_p4) }
  0xaf   : > { %v809_v0 = vld [vmem:[%s4997_s19] sm:$0xff]  ;;  %v810_v1 = vld [vmem:[%s4997_s19 + $0x8] sm:$0xff] }
  0xb0   : > { %v814_v2 = vsel %vm813_vm0, %v809_v0, 0.0  ;;  %v817_v3 = vsel %vm813_vm0, %v810_v1, 0.0 }
  0xb1   : > { %815 = vadd.xlane.f32.xlu0 %v814_v2  ;;  %v3497_v21 = vld [vmem:[%s4998_s17] ss:$0 sm:$0xff] }
  0xb2   : > { %v3498_v23 = vld [vmem:[%s4999_s6] ss:$0 sm:$0xff] }
  0xb5   : > { %818 = vadd.xlane.f32.xlu0 %v817_v3 }
 0x13e   : > { %v816_v4 = vpop.xlane.xlu0 %815 }
 0x13f   : > { %v821_v5 = vmul.f32 0.03125, %v816_v4 }
 0x141   : > { %v823_v6 = vsub.f32 %v809_v0, %v821_v5 }
 0x142   : > { %v819_v7 = vpop.xlane.xlu0 %818 }
 0x143   : > { %v822_v8 = vmul.f32 0.03125, %v819_v7  ;;  %v825_v9 = vmul.f32 %v823_v6, %v823_v6 }
 0x145   : > { %v824_v10 = vsub.f32 %v810_v1, %v822_v8  ;;  %v827_v11 = vsel %vm813_vm0, %v825_v9, 0.0 }
 0x146   : > { %828 = vadd.xlane.f32.xlu1 %v827_v11 }
 0x147   : > { %v826_v12 = vmul.f32 %v824_v10, %v824_v10 }
 0x149   : > { %v830_v13 = vsel %vm813_vm0, %v826_v12, 0.0 }
 0x14a   : > { %831 = vadd.xlane.f32.xlu1 %v830_v13 }
 0x1d3   : > { %v829_v14 = vpop.xlane.xlu1 %828 }
 0x1d4   : > { %v833_v15 = vmul.f32 0.03125, %v829_v14 }
 0x1d6   : > { %v835_v16 = vadd.f32 1e-12, %v833_v15 }
 0x1d7   : > { %v832_v17 = vpop.xlane.xlu1 %831 }
 0x1d8   : > { %3968 = vrsqrt.f32 %v835_v16  ;;  %v834_v18 = vmul.f32 0.03125, %v832_v17 }
 0x1da   : > { %v836_v19 = vadd.f32 1e-12, %v834_v18 }
 0x1dc   : > { %3970 = vrsqrt.f32 %v836_v19 }
 0x1e2   : > { %v3969_v20 = vpop.eup %3968 }
 0x1e3   : > { %v839_v22 = vmul.f32 %v3969_v20, %v823_v6 }
 0x1e5   : > { %v847_v24 = vmul.f32 %v3497_v21, %v839_v22 }
 0x1e6   : > { %v3971_v25 = vpop.eup %3970 }
 0x1e7   : > { %v855_v26 = vadd.f32 %v3498_v23, %v847_v24  ;;  %v840_v27 = vmul.f32 %v3971_v25, %v824_v10 }
 0x1e9   : > { %857 = vst.msk [vmem:[#allocation2] sm:$0xff] %vm813_vm0, %v855_v26  ;;  %v848_v28 = vmul.f32 %v3497_v21, %v840_v27 }
 0x1eb   : > { %v856_v29 = vadd.f32 %v3498_v23, %v848_v28 }
 0x1ed   : > { %858 = vst.msk [vmem:[#allocation2 + $0x8] sm:$0xff] %vm813_vm0, %v856_v29 }
 0x1ee PF: > { %v861_v30 = vld [vmem:[%s4508_s30] sm:$0xff]  ;;  %v862_v31 = vld [vmem:[%s4508_s30 + $0x8] sm:$0xff]  ;;  %v863_v32 = vld [vmem:[%s4508_s30 + $0x10] sm:$0xff]  ;;  %vm872_vm1 = vcmask 261120   ;;  %v4184_v38 = vmov 0.0   ;;  %vm4185_vm2 = vmmov 0   ;;  %s5000_s4 = scalar_lea.vmem %s4926_s5, %s4529_s14  ;;  %s5002_s23 = scalar_lea.vmem %s4928_s7, %s4529_s14 }
 0x1ef   : > { %v3826_v33 = vpack.c.bf16 %v862_v31, %v861_v30  ;;  %v864_v34 = vld [vmem:[%s4508_s30 + $0x18] sm:$0xff]  ;;  %3674 = vmatprep.subr.mxu0 %v4184_v38  ;;  %3676 = vmatprep.mubr.msk.f32.mxu0 %vm4185_vm2, %v4184_v38  ;;  %v3499_v39 = vld [vmem:[%s5000_s4] ss:$0 sm:$0xff]  ;;  %s4186_s29 = smov 64   ;;  %s4187_s18 = smov 96   ;;  %vm962_vm3 = vcmask 64512  }
 0x1f0   : > { %v4593_v35 = vld [vmem:[#allocation2] sm:$0xff]  ;;  %v3830_v36 = vpack.c.bf16 %v864_v34, %v863_v32  ;;  %s4188_s26 = smov 88   ;;  %s5001_s13 = sld [smem:[#allocation18_spill]]  ;;  %v4666_v15 = vld [vmem:[%s4515_s20 + $0x8] sm:$0xff] }
 0x1f1   : > { %3646 = vmatprep.mubr.msk.f32.mxu1 %vm872_vm1, %v4593_v35  ;;  %3827 = vmatprep.subr.bf16.mxu1 %v3826_v33  ;;  %s4189_s22 = smov 120   ;;  %v4648_v62 = vld [vmem:[%s4515_s20] sm:$0xff]  ;;  %s4190_s17 = smov 56  }
 0x1f2   : > { %3829 = vmatpush3.bf16.msra.mxu1 %v3826_v33  ;;  %3675 = vmatpush3.msra.mxu0 %v4648_v62  ;;  %s4191_s27 = smov 80   ;;  %s4192_s25 = smov 112  }
 0x1f3   : > { %3831 = vmatprep.subr.bf16.mxu1 %v3830_v36  ;;  %3689 = vmatprep.subr.mxu0 %v4184_v38  ;;  %s4193_s6 = smov 48   ;;  %s4194_s30 = smov 72  }
 0x1f4   : > { %v4597_v37 = vld [vmem:[#allocation2 + $0x8] sm:$0xff]  ;;  %s4195_s2 = smov 104   ;;  %s4196_s4 = smov 40  }
 0x1f5   : > { %p3544_p8 = scmp.ne.s32.totalorder %s4381_s1, 1 }
 0x1f6   : > { %3833 = vmatpush3.bf16.msra.mxu1 %v3830_v36  ;;  %v4632_v47 = vld [vmem:[%s5001_s13] sm:$0xff]  ;;  %s5008_s1 = sld [smem:[#allocation28_spill]] (!%p3544_p8)  ;;  %s5009_s15 = sld [smem:[#allocation29_spill]] (!%p3544_p8) }
 0x1f7   : > { %3649 = vmatprep.subr.mxu1 %v4184_v38 }
 0x1f9   : > { %3647 = vmatmul.mubr.msk.f32.vlgmr.msra.gmra.mrb[0].mxu1 %vm872_vm1, %v4597_v37 }
 0x1fa   : > { %3651 = vmatprep.mubr.msk.f32.mxu1 %vm4185_vm2, %v4184_v38 }
 0x2cc   : > { %v3648_v40 = vpop.f32.mrb[0].mxu1 }
 0x2cd   : > { %v4612_v41 = vadd.f32 %v3648_v40, %v3499_v39  ;;  %v945_v42 = vpop.f32.mrb[1].mxu1 }
 0x2ce   : > { %v4614_v43 = vadd.f32 %v3499_v39, %v945_v42  ;;  %v4702_v42 = vld [vmem:[%s4515_s20 + $0x10] sm:$0xff] }
 0x2d0   : > { %1050 = vrot.lane.b32.xlu1 %v4614_v43, %s4186_s29  ;;  %960 = vrot.lane.b32.xlu0 %v4614_v43, %s4187_s18 }
 0x2d4   : > { %1128 = vrot.lane.b32.xlu1 %v4614_v43, %s4188_s26 }
 0x342   : > { %v961_v44 = vpop.permute.xlu0 %960  ;;  %v1051_v45 = vpop.permute.xlu1 %1050 }
 0x343   : > { %3650 = vmatpush3.xpose.msk.msra.mxu1 %vm962_vm3, %v961_v44 }
 0x344   : > { %3654 = vmatprep.subr.mxu1 %v4184_v38 }
 0x346   : > { %3652 = vmatmul.mubr.msk.f32.vlgmr.msra.gmra.mrb[2].mxu1 %vm962_vm3, %v4614_v43  ;;  %v1129_v57 = vpop.permute.xlu1 %1128 }
 0x347   : > { %3655 = vmatpush3.msra.mxu1 %v1051_v45  ;;  %3656 = vmatprep.mubr.msk.f32.mxu1 %vm4185_vm2, %v4184_v38 }
 0x348   : > { %3659 = vmatprep.subr.mxu1 %v4184_v38 }
 0x419   : > { %v1033_v46 = vpop.f32.mrb[2].mxu1 }
 0x41a   : > { %v1037_v48 = vmul.f32 0.35355338, %v1033_v46  ;;  %v3653_v49 = vpop.f32.mrb[3].mxu1 }
 0x41c   : > { %v1038_v50 = vadd.f32 %v1037_v48, %v4632_v47 }
 0x41e   : > { %v1039_v51 = vsel %vm962_vm3, %v1038_v50, -inf }
 0x41f   : > { %1040 = vmax.xlane.f32.xlu0 %v1039_v51 }
 0x4ac   : > { %v1041_v52 = vpop.xlane.xlu0 %1040 }
 0x4ad   : > { %v1042_v53 = vsub.f32 %v1038_v50, %v1041_v52 }
 0x4af   : > { %v1043_v54 = vmul.f32 1.442695, %v1042_v53 }
 0x4b1   : > { %3972 = vpow2.f32 %v1043_v54 }
 0x4bb   : > { %v3973_v55 = vpop.eup %3972 }
 0x4bc   : > { %v1045_v56 = vsel %vm962_vm3, %v3973_v55, 0.0 }
 0x4bd   : > { %1046 = vadd.xlane.f32.xlu1 %v1045_v56 }
 0x4ce   : > { %1126 = vrot.lane.b32.xlu1 %v4614_v43, %s4189_s22 }
 0x54a   : > { %v1047_v58 = vpop.xlane.xlu1 %1046 }
 0x54b   : > { %3974 = vrcp.f32 %v1047_v58 }
 0x54e   : > { %v1127_v61 = vpop.permute.xlu1 %1126 }
 0x555   : > { %v3975_v59 = vpop.eup %3974 }
 0x556   : > { %v1049_v60 = vmul.f32 %v3975_v59, %v3973_v55 }
 0x558   : > { %3657 = vmatmul.mubr.msk.f32.vlgmr.msra.gmra.mrb[4].mxu1 %vm962_vm3, %v1049_v60 }
 0x559   : > { %3660 = vmatpush3.xpose.msk.msra.mxu1 %vm962_vm3, %v1129_v57  ;;  %3661 = vmatprep.mubr.msk.f32.mxu1 %vm4185_vm2, %v4184_v38 }
 0x55a   : > { %3664 = vmatprep.subr.mxu1 %v4184_v38 }
 0x55c   : > { %3662 = vmatmul.mubr.msk.f32.vlgmr.msra.gmra.mrb[6].mxu1 %vm962_vm3, %v1127_v61 }
 0x55d   : > { %3666 = vmatprep.mubr.msk.f32.mxu1 %vm4185_vm2, %v4184_v38 }
 0x62b   : > { %v1122_v63 = vpop.f32.mrb[4].mxu1 }
 0x62c   : > { %v3658_v0 = vpop.f32.mrb[5].mxu1  ;;  %3677 = vmatmul.mubr.msk.f32.vlgmr.msra.gmra.mrb[0].mxu0 %vm962_vm3, %v1122_v63  ;;  %v4738_v63 = vld [vmem:[%s5001_s13 + $0x8] sm:$0xff] }
 0x62d   : > { %3691 = vmatprep.mubr.msk.f32.mxu0 %vm4185_vm2, %v4184_v38  ;;  %3690 = vmatpush3.msra.mxu0 %v4702_v42 }
 0x62e   : > { %3699 = vmatprep.subr.mxu0 %v4184_v38 }
 0x62f   : > { %v1200_v1 = vpop.f32.mrb[6].mxu1 }
 0x630   : > { %v1204_v2 = vmul.f32 0.35355338, %v1200_v1  ;;  %v3663_v3 = vpop.f32.mrb[7].mxu1 }
 0x632   : > { %v1205_v4 = vadd.f32 %v1204_v2, %v4632_v47 }
 0x634   : > { %v1206_v5 = vsel %vm962_vm3, %v1205_v4, -inf }
 0x635   : > { %1207 = vmax.xlane.f32.xlu1 %v1206_v5 }
 0x6c2   : > { %v1208_v6 = vpop.xlane.xlu1 %1207 }
 0x6c3   : > { %v1209_v7 = vsub.f32 %v1205_v4, %v1208_v6 }
 0x6c5   : > { %v1210_v8 = vmul.f32 1.442695, %v1209_v7 }
 0x6c7   : > { %3976 = vpow2.f32 %v1210_v8 }
 0x6d1   : > { %v3977_v9 = vpop.eup %3976 }
 0x6d2   : > { %v1212_v10 = vsel %vm962_vm3, %v3977_v9, 0.0 }
 0x6d3   : > { %1213 = vadd.xlane.f32.xlu0 %v1212_v10 }
 0x6e9   : > { %1217 = vrot.lane.b32.xlu0 %v4614_v43, %s4190_s17 }
 0x6ed   : > { %1441 = vrot.lane.b32.xlu0 %v4614_v43, %s4191_s27 }
 0x6f1   : > { %1439 = vrot.lane.b32.xlu0 %v4614_v43, %s4192_s25 }
 0x760   : > { %v1214_v11 = vpop.xlane.xlu0 %1213 }
 0x761   : > { %3978 = vrcp.f32 %v1214_v11 }
 0x764   : > { %v1218_v12 = vpop.permute.xlu0 %1217 }
 0x765   : > { %3665 = vmatpush3.msra.mxu1 %v1218_v12 }
 0x766   : > { %3669 = vmatprep.subr.mxu1 %v4184_v38 }
 0x768   : > { %v1442_v16 = vpop.permute.xlu0 %1441 }
 0x76b   : > { %v3979_v13 = vpop.eup %3978 }
 0x76c   : > { %v1216_v14 = vmul.f32 %v3979_v13, %v3977_v9  ;;  %v1440_v19 = vpop.permute.xlu0 %1439 }
 0x76e   : > { %3667 = vmatmul.mubr.msk.f32.vlgmr.msra.gmra.mrb[8].mxu1 %vm962_vm3, %v1216_v14 }
 0x76f   : > { %3670 = vmatpush3.msra.mxu1 %v4666_v15  ;;  %3671 = vmatprep.mubr.msk.f32.mxu1 %vm4185_vm2, %v4184_v38 }
 0x770   : > { %3679 = vmatprep.subr.mxu1 %v4184_v38 }
 0x841   : > { %v1289_v17 = vpop.f32.mrb[8].mxu1 }
 0x842   : > { %v3668_v18 = vpop.f32.mrb[9].mxu1  ;;  %3672 = vmatmul.mubr.msk.f32.vlgmr.msra.gmra.mrb[10].mxu1 %vm962_vm3, %v1289_v17 }
 0x843   : > { %3680 = vmatpush3.xpose.msk.msra.mxu1 %vm962_vm3, %v1442_v16  ;;  %3681 = vmatprep.mubr.msk.f32.mxu1 %vm4185_vm2, %v4184_v38 }
 0x844   : > { %3684 = vmatprep.subr.mxu1 %v4184_v38 }
 0x846   : > { %3682 = vmatmul.mubr.msk.f32.vlgmr.msra.gmra.mrb[12].mxu1 %vm962_vm3, %v1440_v19 }
 0x847   : > { %3686 = vmatprep.mubr.msk.f32.mxu1 %vm4185_vm2, %v4184_v38 }
 0x915   : > { %v4681_v20 = vpop.f32.mrb[10].mxu1 }
 0x916   : > { %v3673_v21 = vpop.f32.mrb[11].mxu1 }
 0x919   : > { %v1513_v22 = vpop.f32.mrb[12].mxu1 }
 0x91a   : > { %v1517_v23 = vmul.f32 0.35355338, %v1513_v22  ;;  %v3683_v24 = vpop.f32.mrb[13].mxu1 }
 0x91c   : > { %v1518_v25 = vadd.f32 %v1517_v23, %v4632_v47 }
 0x91e   : > { %v1519_v26 = vsel %vm962_vm3, %v1518_v25, -inf }
 0x91f   : > { %1520 = vmax.xlane.f32.xlu1 %v1519_v26 }
 0x930   : > { %1530 = vrot.lane.b32.xlu1 %v4614_v43, %s4193_s6 }
 0x934   : > { %1682 = vrot.lane.b32.xlu1 %v4614_v43, %s4194_s30 }
 0x938   : > { %1680 = vrot.lane.b32.xlu1 %v4614_v43, %s4195_s2 }
 0x9ac   : > { %v1521_v27 = vpop.xlane.xlu1 %1520 }
 0x9ad   : > { %v1522_v28 = vsub.f32 %v1518_v25, %v1521_v27 }
 0x9af   : > { %v1523_v29 = vmul.f32 1.442695, %v1522_v28 }
 0x9b0   : > { %v1531_v30 = vpop.permute.xlu1 %1530 }
 0x9b1   : > { %3980 = vpow2.f32 %v1523_v29  ;;  %3685 = vmatpush3.msra.mxu1 %v1531_v30 }
 0x9b2   : > { %3694 = vmatprep.subr.mxu1 %v4184_v38 }
 0x9b4   : > { %v1683_v36 = vpop.permute.xlu1 %1682 }
 0x9b8   : > { %v1681_v40 = vpop.permute.xlu1 %1680 }
 0x9bb   : > { %v3981_v31 = vpop.eup %3980 }
 0x9bc   : > { %v1525_v32 = vsel %vm962_vm3, %v3981_v31, 0.0 }
 0x9bd   : > { %1526 = vadd.xlane.f32.xlu0 %v1525_v32 }
 0xa4a   : > { %v1527_v33 = vpop.xlane.xlu0 %1526 }
 0xa4b   : > { %3982 = vrcp.f32 %v1527_v33 }
 0xa55   : > { %v3983_v34 = vpop.eup %3982 }
 0xa56   : > { %v1529_v39 = vmul.f32 %v3983_v34, %v3981_v31 }
 0xa58   : > { %3687 = vmatmul.mubr.msk.f32.vlgmr.msra.gmra.mrb[14].mxu1 %vm962_vm3, %v1529_v39 }
 0xa59   : > { %3695 = vmatpush3.xpose.msk.msra.mxu1 %vm962_vm3, %v1683_v36  ;;  %3696 = vmatprep.mubr.msk.f32.mxu1 %vm4185_vm2, %v4184_v38 }
 0xa5a   : > { %3709 = vmatprep.subr.mxu1 %v4184_v38 }
 0xa5c   : > { %3697 = vmatmul.mubr.msk.f32.vlgmr.msra.gmra.mrb[16].mxu1 %vm962_vm3, %v1681_v40 }
 0xa5d   : > { %3711 = vmatprep.mubr.msk.f32.mxu1 %vm4185_vm2, %v4184_v38 }
 0xb2b   : > { %v1602_v44 = vpop.f32.mrb[14].mxu1 }
 0xb2c   : > { %v3688_v45 = vpop.f32.mrb[15].mxu1  ;;  %3692 = vmatmul.mubr.msk.f32.vlgmr.msra.gmra.mrb[0].mxu0 %vm962_vm3, %v1602_v44 }
 0xb2d   : > { %3701 = vmatprep.mubr.msk.f32.mxu0 %vm4185_vm2, %v4184_v38 }
 0xb2f   : > { %v1754_v46 = vpop.f32.mrb[16].mxu1 }
 0xb30   : > { %v1758_v48 = vmul.f32 0.35355338, %v1754_v46  ;;  %v3698_v49 = vpop.f32.mrb[17].mxu1 }
 0xb32   : > { %v1759_v50 = vadd.f32 %v1758_v48, %v4632_v47 }
 0xb34   : > { %v1760_v51 = vsel %vm962_vm3, %v1759_v50, -inf }
 0xb35   : > { %1761 = vmax.xlane.f32.xlu1 %v1760_v51 }
 0xb46   : > { %2090 = vrot.lane.b32.xlu1 %v4612_v41, %s4189_s22 }
 0xbc2   : > { %v1762_v52 = vpop.xlane.xlu1 %1761 }
 0xbc3   : > { %v1763_v53 = vsub.f32 %v1759_v50, %v1762_v52 }
 0xbc5   : > { %v1764_v54 = vmul.f32 1.442695, %v1763_v53 }
 0xbc6   : > { %v2091_v7 = vpop.permute.xlu1 %2090 }
 0xbc7   : > { %3984 = vpow2.f32 %v1764_v54 }
 0xbd1   : > { %v3985_v55 = vpop.eup %3984 }
 0xbd2   : > { %v1766_v56 = vsel %vm962_vm3, %v3985_v55, 0.0 }
 0xbd3   : > { %1767 = vadd.xlane.f32.xlu0 %v1766_v56 }
 0xbe9   : > { %1771 = vrot.lane.b32.xlu0 %v4614_v43, %s4196_s4  ;;  %v4726_v43 = vld [vmem:[%s4515_s20 + $0x18] sm:$0xff] }
 0xbed   : > { %1925 = vrot.lane.b32.xlu0 %v4612_v41, %s4187_s18 }
 0xbf1   : > { %2092 = vrot.lane.b32.xlu0 %v4612_v41, %s4188_s26 }
 0xc60   : > { %v1768_v47 = vpop.xlane.xlu0 %1767 }
 0xc61   : > { %3986 = vrcp.f32 %v1768_v47 }
 0xc64   : > { %v1772_v57 = vpop.permute.xlu0 %1771 }
 0xc65   : > { %3700 = vmatpush3.msra.mxu0 %v1772_v57 }
 0xc66   : > { %3704 = vmatprep.subr.mxu0 %v4184_v38 }
 0xc68   : > { %v1926_v58 = vpop.permute.xlu0 %1925 }
 0xc69   : > { %3710 = vmatpush3.xpose.msk.msra.mxu1 %vm962_vm3, %v1926_v58 }
 0xc6a   : > { %3714 = vmatprep.subr.mxu1 %v4184_v38 }
 0xc6b   : > { %v3987_v59 = vpop.eup %3986 }
 0xc6c   : > { %v1770_v60 = vmul.f32 %v3987_v59, %v3985_v55  ;;  %3712 = vmatmul.mubr.msk.f32.vlgmr.msra.gmra.mrb[18].mxu1 %vm962_vm3, %v4612_v41  ;;  %v2093_v3 = vpop.permute.xlu0 %2092 }
 0xc6d   : > { %3716 = vmatprep.mubr.msk.f32.mxu1 %vm4185_vm2, %v4184_v38 }
 0xc6e   : > { %3702 = vmatmul.mubr.msk.f32.vlgmr.msra.gmra.mrb[2].mxu0 %vm962_vm3, %v1770_v60 }
 0xc6f   : > { %3705 = vmatpush3.msra.mxu0 %v4726_v43  ;;  %3706 = vmatprep.mubr.msk.f32.mxu0 %vm4185_vm2, %v4184_v38 }
 0xc70   : > { %3719 = vmatprep.subr.mxu0 %v4184_v38 }
 0xd3f   : > { %v1997_v61 = vpop.f32.mrb[18].mxu1 }
 0xd40   : > { %v2001_v0 = vmul.f32 0.35355338, %v1997_v61  ;;  %v3713_v1 = vpop.f32.mrb[19].mxu1 }
 0xd41   : > { %v1843_v2 = vpop.f32.mrb[2].mxu0 }
 0xd42   : > { %v3703_v4 = vpop.f32.mrb[3].mxu0  ;;  %3707 = vmatmul.mubr.msk.f32.vlgmr.msra.gmra.mrb[0].mxu0 %vm962_vm3, %v1843_v2  ;;  %v2002_v5 = vadd.f32 %v4738_v63, %v2001_v0 }
 0xd43   : > { %3720 = vmatpush3.xpose.msk.msra.mxu0 %vm962_vm3, %v2093_v3  ;;  %3721 = vmatprep.mubr.msk.f32.mxu0 %vm4185_vm2, %v4184_v38 }
 0xd44   : > { %v2003_v6 = vsel %vm962_vm3, %v2002_v5, -inf  ;;  %3729 = vmatprep.subr.mxu0 %v4184_v38 }
 0xd45   : > { %2004 = vmax.xlane.f32.xlu0 %v2003_v6 }
 0xd46   : > { %3722 = vmatmul.mubr.msk.f32.vlgmr.msra.gmra.mrb[4].mxu0 %vm962_vm3, %v2091_v7 }
 0xd47   : > { %3730 = vmatpush3.msra.mxu0 %v4666_v15  ;;  %3731 = vmatprep.mubr.msk.f32.mxu0 %vm4185_vm2, %v4184_v38 }
 0xd48   : > { %3734 = vmatprep.subr.mxu0 %v4184_v38 }
 0xdd2   : > { %v2005_v8 = vpop.xlane.xlu0 %2004 }
 0xdd3   : > { %v2006_v9 = vsub.f32 %v2002_v5, %v2005_v8 }
 0xdd5   : > { %v2007_v10 = vmul.f32 1.442695, %v2006_v9 }
 0xdd7   : > { %3988 = vpow2.f32 %v2007_v10 }
 0xde1   : > { %v3989_v11 = vpop.eup %3988 }
 0xde2   : > { %v2009_v12 = vsel %vm962_vm3, %v3989_v11, 0.0 }
 0xde3   : > { %2010 = vadd.xlane.f32.xlu0 %v2009_v12 }
 0xdf9   : > { %2014 = vrot.lane.b32.xlu0 %v4612_v41, %s4186_s29 }
 0xdfd   : > { %2405 = vrot.lane.b32.xlu0 %v4612_v41, %s4191_s27 }
 0xe15   : > { %v1916_v13 = vpop.f32.mrb[0].mxu0 }
 0xe16   : > { %v3882_v14 = vadd.f32 %v1916_v13, %v4681_v20  ;;  %v3708_v15 = vpop.f32.mrb[1].mxu0 }
 0xe18   : > { %1921 = vst.msk [vmem:[#allocation3] sm:$0xff] %vm872_vm1, %v3882_v14 }
 0xe19   : > { %v2164_v16 = vpop.f32.mrb[4].mxu0 }
 0xe1a   : > { %v2168_v17 = vmul.f32 0.35355338, %v2164_v16  ;;  %v3723_v18 = vpop.f32.mrb[5].mxu0 }
 0xe1c   : > { %v2169_v19 = vadd.f32 %v4738_v63, %v2168_v17 }
 0xe1e   : > { %v2170_v21 = vsel %vm962_vm3, %v2169_v19, -inf }
 0xe1f   : > { %2171 = vmax.xlane.f32.xlu1 %v2170_v21  ;;  %v2886_v9 = vld [vmem:[#allocation3] sm:$0xff] }
 0xe30   : > { %2181 = vrot.lane.b32.xlu1 %v4612_v41, %s4190_s17  ;;  %s5003_s17 = scalar_lea.vmem %s4929_s8, %s4529_s14 }
 0xe70   : > { %v2011_v22 = vpop.xlane.xlu0 %2010 }
 0xe71   : > { %3990 = vrcp.f32 %v2011_v22 }
 0xe74   : > { %v2015_v23 = vpop.permute.xlu0 %2014 }
 0xe75   : > { %3715 = vmatpush3.msra.mxu1 %v2015_v23 }
 0xe76   : > { %3724 = vmatprep.subr.mxu1 %v4184_v38 }
 0xe78   : > { %v2406_v31 = vpop.permute.xlu0 %2405 }
 0xe7b   : > { %v3991_v20 = vpop.eup %3990 }
 0xe7c   : > { %v2013_v24 = vmul.f32 %v3991_v20, %v3989_v11 }
 0xe7e   : > { %3717 = vmatmul.mubr.msk.f32.vlgmr.msra.gmra.mrb[20].mxu1 %vm962_vm3, %v2013_v24 }
 0xe7f   : > { %3726 = vmatprep.mubr.msk.f32.mxu1 %vm4185_vm2, %v4184_v38 }
 0xeac   : > { %v2172_v25 = vpop.xlane.xlu1 %2171 }
 0xead   : > { %v2173_v26 = vsub.f32 %v2169_v19, %v2172_v25 }
 0xeaf   : > { %v2174_v27 = vmul.f32 1.442695, %v2173_v26 }
 0xeb0   : > { %v2182_v28 = vpop.permute.xlu1 %2181 }
 0xeb1   : > { %3992 = vpow2.f32 %v2174_v27  ;;  %3725 = vmatpush3.msra.mxu1 %v2182_v28 }
 0xeb2   : > { %3739 = vmatprep.subr.mxu1 %v4184_v38 }
 0xebb   : > { %v3993_v29 = vpop.eup %3992 }
 0xebc   : > { %v2176_v30 = vsel %vm962_vm3, %v3993_v29, 0.0 }
 0xebd   : > { %2177 = vadd.xlane.f32.xlu0 %v2176_v30 }
 0xed3   : > { %2403 = vrot.lane.b32.xlu0 %v4612_v41, %s4192_s25 }
 0xf4a   : > { %v2178_v32 = vpop.xlane.xlu0 %2177 }
 0xf4b   : > { %3994 = vrcp.f32 %v2178_v32 }
 0xf4e   : > { %v2404_v40 = vpop.permute.xlu0 %2403 }
 0xf51   : > { %v2086_v33 = vpop.f32.mrb[20].mxu1 }
 0xf52   : > { %v3718_v34 = vpop.f32.mrb[21].mxu1 }
 0xf55   : > { %v3995_v36 = vpop.eup %3994 }
 0xf56   : > { %v2180_v39 = vmul.f32 %v3995_v36, %v3993_v29  ;;  %v3536_v36 = vld [vmem:[%s5003_s17] ss:$0 sm:$0xff] }
 0xf58   : > { %3727 = vmatmul.mubr.msk.f32.vlgmr.msra.gmra.mrb[22].mxu1 %vm962_vm3, %v2180_v39 }
 0xf59   : > { %3740 = vmatpush3.xpose.msk.msra.mxu1 %vm962_vm3, %v2406_v31  ;;  %3741 = vmatprep.mubr.msk.f32.mxu1 %vm4185_vm2, %v4184_v38 }
 0xf5a   : > { %3744 = vmatprep.subr.mxu1 %v4184_v38 }
 0xf5c   : > { %3742 = vmatmul.mubr.msk.f32.vlgmr.msra.gmra.mrb[24].mxu1 %vm962_vm3, %v2404_v40 }
 0xf5d   : > { %3746 = vmatprep.mubr.msk.f32.mxu1 %vm4185_vm2, %v4184_v38 }
0x102b   : > { %v2253_v44 = vpop.f32.mrb[22].mxu1 }
0x102c   : > { %v3728_v45 = vpop.f32.mrb[23].mxu1  ;;  %3732 = vmatmul.mubr.msk.f32.vlgmr.msra.gmra.mrb[6].mxu0 %vm962_vm3, %v2253_v44 }
0x102d   : > { %3735 = vmatpush3.msra.mxu0 %v4648_v62  ;;  %3736 = vmatprep.mubr.msk.f32.mxu0 %vm4185_vm2, %v4184_v38 }
0x102e   : > { %3749 = vmatprep.subr.mxu0 %v4184_v38 }
0x102f   : > { %v2477_v46 = vpop.f32.mrb[24].mxu1 }
0x1030   : > { %v2481_v48 = vmul.f32 0.35355338, %v2477_v46  ;;  %v3743_v49 = vpop.f32.mrb[25].mxu1  ;;  %v2944_v46 = vld [vmem:[%s4521_s21] sm:$0xff] }
0x1032   : > { %v2482_v50 = vadd.f32 %v4738_v63, %v2481_v48  ;;  %v2945_v48 = vld [vmem:[%s4521_s21 + $0x8] sm:$0xff] }
0x1033   : > { %v3834_v49 = vpack.c.bf16 %v2945_v48, %v2944_v46 }
0x1034   : > { %3737 = vmatmul.mubr.msk.f32.vlgmr.msra.gmra.mrb[6].mxu0 %vm962_vm3, %v2086_v33  ;;  %v2483_v51 = vsel %vm962_vm3, %v2482_v50, -inf }
0x1035   : > { %2484 = vmax.xlane.f32.xlu1 %v2483_v51  ;;  %3750 = vmatpush3.msra.mxu0 %v4702_v42  ;;  %v2947_v51 = vld [vmem:[%s4521_s21 + $0x18] sm:$0xff] }
0x1036   : > { %3751 = vmatprep.mubr.msk.f32.mxu0 %vm4185_vm2, %v4184_v38  ;;  %3759 = vmatprep.subr.mxu0 %v4184_v38 }
0x1046   : > { %2646 = vrot.lane.b32.xlu1 %v4612_v41, %s4194_s30 }
0x104a   : > { %2644 = vrot.lane.b32.xlu1 %v4612_v41, %s4195_s2 }
0x10c2   : > { %v2485_v62 = vpop.xlane.xlu1 %2484 }
0x10c3   : > { %v2486_v52 = vsub.f32 %v2482_v50, %v2485_v62  ;;  %v2946_v50 = vld [vmem:[%s4521_s21 + $0x10] sm:$0xff] }
0x10c4   : > { %v3838_v62 = vpack.c.bf16 %v2947_v51, %v2946_v50 }
0x10c5   : > { %v2487_v53 = vmul.f32 1.442695, %v2486_v52 }
0x10c6   : > { %v2647_v57 = vpop.permute.xlu1 %2646 }
0x10c7   : > { %3996 = vpow2.f32 %v2487_v53 }
0x10ca   : > { %v2645_v59 = vpop.permute.xlu1 %2644 }
0x10d1   : > { %v3997_v54 = vpop.eup %3996 }
0x10d2   : > { %v2489_v55 = vsel %vm962_vm3, %v3997_v54, 0.0 }
0x10d3   : > { %2490 = vadd.xlane.f32.xlu0 %v2489_v55 }
0x10e9   : > { %2494 = vrot.lane.b32.xlu0 %v4612_v41, %s4193_s6  ;;  %s5004_s6 = scalar_lea.vmem %s4930_s9, %s4529_s14 }
0x10ea   : > { %v3537_v40 = vld [vmem:[%s5004_s6] ss:$0 sm:$0xff] }
0x1160   : > { %v2491_v42 = vpop.xlane.xlu0 %2490 }
0x1161   : > { %3998 = vrcp.f32 %v2491_v42 }
0x1164   : > { %v2495_v56 = vpop.permute.xlu0 %2494 }
0x1165   : > { %3745 = vmatpush3.msra.mxu1 %v2495_v56 }
0x1166   : > { %3754 = vmatprep.subr.mxu1 %v4184_v38 }
0x116b   : > { %v3999_v47 = vpop.eup %3998 }
0x116c   : > { %v2493_v58 = vmul.f32 %v3999_v47, %v3997_v54 }
0x116e   : > { %3747 = vmatmul.mubr.msk.f32.vlgmr.msra.gmra.mrb[26].mxu1 %vm962_vm3, %v2493_v58  ;;  %v3055_v58 = vld [vmem:[%s4555_s3 + $0x8] sm:$0xff] }
0x116f   : > { %3755 = vmatpush3.xpose.msk.msra.mxu1 %vm962_vm3, %v2647_v57  ;;  %3756 = vmatprep.mubr.msk.f32.mxu1 %vm4185_vm2, %v4184_v38  ;;  %v3054_v57 = vld [vmem:[%s4555_s3] sm:$0xff] }
0x1170   : > { %3835 = vmatprep.subr.bf16.mxu1 %v3834_v49 }
0x1172   : > { %3757 = vmatmul.mubr.msk.f32.vlgmr.msra.gmra.mrb[28].mxu1 %vm962_vm3, %v2645_v59  ;;  %v3842_v59 = vpack.c.bf16 %v3055_v58, %v3054_v57 }
0x1173   : > { %3837 = vmatpush3.bf16.msra.mxu1 %v3834_v49 }
0x1174   : > { %3839 = vmatprep.subr.bf16.mxu1 %v3838_v62 }
0x1177   : > { %3841 = vmatpush3.bf16.msra.mxu1 %v3838_v62 }
0x1241   : > { %v2566_v60 = vpop.f32.mrb[26].mxu1 }
0x1242   : > { %v3748_v61 = vpop.f32.mrb[27].mxu1  ;;  %3752 = vmatmul.mubr.msk.f32.vlgmr.msra.gmra.mrb[6].mxu0 %vm962_vm3, %v2566_v60  ;;  %v3056_v60 = vld [vmem:[%s4555_s3 + $0x10] sm:$0xff] }
0x1243   : > { %3761 = vmatprep.mubr.msk.f32.mxu0 %vm4185_vm2, %v4184_v38  ;;  %v3057_v61 = vld [vmem:[%s4555_s3 + $0x18] sm:$0xff] }
0x1245   : > { %v2718_v0 = vpop.f32.mrb[28].mxu1 }
0x1246   : > { %v2722_v1 = vmul.f32 0.35355338, %v2718_v0  ;;  %v3758_v2 = vpop.f32.mrb[29].mxu1  ;;  %v3846_v0 = vpack.c.bf16 %v3057_v61, %v3056_v60 }
0x1247   : > { %v3059_v2 = vld [vmem:[%s4555_s3 + $0x28] sm:$0xff] }
0x1248   : > { %v2723_v3 = vadd.f32 %v4738_v63, %v2722_v1  ;;  %v3535_v63 = vld [vmem:[%s5002_s23] ss:$0 sm:$0xff] }
0x1249   : > { %v2895_v10 = vadd.f32 %v3535_v63, %v2886_v9  ;;  %v3058_v1 = vld [vmem:[%s4555_s3 + $0x20] sm:$0xff]  ;;  %v3064_v9 = vld [vmem:[%s4555_s3 + $0x50] sm:$0xff] }
0x124a   : > { %v2724_v4 = vsel %vm962_vm3, %v2723_v3, -inf }
0x124b   : > { %2725 = vmax.xlane.f32.xlu0 %v2724_v4  ;;  %v3060_v4 = vld [vmem:[%s4555_s3 + $0x30] sm:$0xff] }
0x1261   : > { %2735 = vrot.lane.b32.xlu0 %v4612_v41, %s4196_s4  ;;  %v2897_v41 = vadd.f32 %v2895_v10, %v4593_v35  ;;  %v3065_v10 = vld [vmem:[%s4555_s3 + $0x58] sm:$0xff] }
0x1263   : > { %v2901_v13 = vsel %vm872_vm1, %v2897_v41, 0.0 }
0x12d8   : > { %v2726_v5 = vpop.xlane.xlu0 %2725 }
0x12d9   : > { %v2727_v6 = vsub.f32 %v2723_v3, %v2726_v5  ;;  %v3850_v3 = vpack.c.bf16 %v3059_v2, %v3058_v1  ;;  %v3061_v5 = vld [vmem:[%s4555_s3 + $0x38] sm:$0xff] }
0x12db   : > { %v2728_v7 = vmul.f32 1.442695, %v2727_v6  ;;  %v3854_v6 = vpack.c.bf16 %v3061_v5, %v3060_v4  ;;  %v3542_v4 = vld [vmem:[%s801_s10] ss:$0 sm:$0xff] }
0x12dc   : > { %v2736_v8 = vpop.permute.xlu0 %2735 }
0x12dd   : > { %4000 = vpow2.f32 %v2728_v7  ;;  %3760 = vmatpush3.msra.mxu0 %v2736_v8  ;;  %v3062_v7 = vld [vmem:[%s4555_s3 + $0x40] sm:$0xff]  ;;  %v3063_v8 = vld [vmem:[%s4555_s3 + $0x48] sm:$0xff] }
0x12de   : > { %3764 = vmatprep.subr.mxu0 %v4184_v38 }
0x12e7   : > { %v4001_v11 = vpop.eup %4000 }
0x12e8   : > { %v2730_v12 = vsel %vm962_vm3, %v4001_v11, 0.0 }
0x12e9   : > { %2731 = vadd.xlane.f32.xlu1 %v2730_v12  ;;  %v3066_v12 = vld [vmem:[%s4555_s3 + $0x60] sm:$0xff] }
0x12ed   : > { %2902 = vadd.xlane.f32.xlu1 %v2901_v13 }
0x1376   : > { %v2732_v14 = vpop.xlane.xlu1 %2731 }
0x1377   : > { %4002 = vrcp.f32 %v2732_v14  ;;  %v3068_v14 = vld [vmem:[%s4555_s3 + $0x70] sm:$0xff] }
0x137a   : > { %v2903_v21 = vpop.xlane.xlu1 %2902 }
0x137b   : > { %v2908_v22 = vmul.f32 0.03125, %v2903_v21 }
0x137d   : > { %v2910_v20 = vsub.f32 %v2897_v41, %v2908_v22  ;;  %v3067_v41 = vld [vmem:[%s4555_s3 + $0x68] sm:$0xff] }
0x137e   : > { %v3866_v13 = vpack.c.bf16 %v3067_v41, %v3066_v12  ;;  %v3206_v12 = vld [vmem:[#allocation9] sm:$0xff] (!%p3544_p8)  ;;  %v3207_v41 = vld [vmem:[#allocation9 + $0x8] sm:$0xff] (!%p3544_p8) }
0x137f   : > { %v2912_v26 = vmul.f32 %v2910_v20, %v2910_v20 }
0x1381   : > { %v4003_v15 = vpop.eup %4002 }
0x1382   : > { %v2734_v16 = vmul.f32 %v4003_v15, %v4001_v11  ;;  %v3862_v11 = vpack.c.bf16 %v3065_v10, %v3064_v9  ;;  %v3069_v15 = vld [vmem:[%s4555_s3 + $0x78] sm:$0xff] }
0x1384   : > { %3762 = vmatmul.mubr.msk.f32.vlgmr.msra.gmra.mrb[8].mxu0 %vm962_vm3, %v2734_v16  ;;  %v3870_v16 = vpack.c.bf16 %v3069_v15, %v3068_v14  ;;  %v3874_v15 = vpack.c.bf16 (!%p3544_p8), %v3207_v41, %v3206_v12 }
0x1385   : > { %3765 = vmatpush3.msra.mxu0 %v4726_v43  ;;  %3766 = vmatprep.mubr.msk.f32.mxu0 %vm4185_vm2, %v4184_v38  ;;  %v2914_v38 = vsel %vm872_vm1, %v2912_v26, 0.0 }
0x1386   : > { %3843 = vmatprep.subr.bf16.mxu0 %v3842_v59 }
0x1457   : > { %v2807_v17 = vpop.f32.mrb[8].mxu0 }
0x1458   : > { %v3763_v18 = vpop.f32.mrb[9].mxu0  ;;  %3767 = vmatmul.mubr.msk.f32.vlgmr.msra.gmra.mrb[6].mxu0 %vm962_vm3, %v2807_v17  ;;  %v3538_v17 = vld [vmem:[%s790_s0] ss:$0 sm:$0xff] }
0x1459   : > { %3845 = vmatpush3.bf16.msra.mxu0 %v3842_v59 }
0x145a   : > { %3847 = vmatprep.subr.bf16.mxu0 %v3846_v0 }
0x145d   : > { %3849 = vmatpush3.bf16.msra.mxu0 %v3846_v0 }
0x145e   : > { %3851 = vmatprep.subr.bf16.mxu0 %v3850_v3 }
0x1461   : > { %3853 = vmatpush3.bf16.msra.mxu0 %v3850_v3 }
0x1462   : > { %3855 = vmatprep.subr.bf16.mxu0 %v3854_v6 }
0x1465   : > { %3857 = vmatpush3.bf16.msra.mxu0 %v3854_v6  ;;  %v3543_v6 = vld [vmem:[%s804_s16] ss:$0 sm:$0xff] }
0x152b   : > { %v2880_v35 = vpop.f32.mrb[6].mxu0 }
0x152c   : > { %2885 = vst.msk [vmem:[#allocation3 + $0x8] sm:$0xff] %vm872_vm1, %v2880_v35  ;;  %v3768_v19 = vpop.f32.mrb[7].mxu0 }
0x1533   : > { %v2887_v23 = vld [vmem:[#allocation3 + $0x8] sm:$0xff] }
0x1534   : > { %v2896_v24 = vadd.f32 %v3535_v63, %v2887_v23  ;;  %v3858_v63 = vpack.c.bf16 %v3063_v8, %v3062_v7 }
0x1536   : > { %v2898_v25 = vadd.f32 %v2896_v24, %v4597_v37  ;;  %3859 = vmatprep.subr.bf16.mxu0 %v3858_v63 }
0x1537   : > { %3861 = vmatpush3.bf16.msra.mxu0 %v3858_v63 }
0x1538   : > { %v2904_v43 = vsel %vm872_vm1, %v2898_v25, 0.0  ;;  %3863 = vmatprep.subr.bf16.mxu0 %v3862_v11 }
0x1539   : > { %2905 = vadd.xlane.f32.xlu1 %v2904_v43 }
0x153b   : > { %3865 = vmatpush3.bf16.msra.mxu0 %v3862_v11 }
0x153c   : > { %3867 = vmatprep.subr.bf16.mxu0 %v3866_v13 }
0x153d   : > { %2915 = vadd.xlane.f32.xlu1 %v2914_v38 }
0x153f   : > { %3869 = vmatpush3.bf16.msra.mxu0 %v3866_v13  ;;  %v3208_v13 = vld [vmem:[#allocation9 + $0x10] sm:$0xff] (!%p3544_p8) }
0x1540   : > { %3871 = vmatprep.subr.bf16.mxu0 %v3870_v16 }
0x1543   : > { %3873 = vmatpush3.bf16.msra.mxu0 %v3870_v16  ;;  %v3209_v16 = vld [vmem:[#allocation9 + $0x18] sm:$0xff] (!%p3544_p8) }
0x1544   : > { %3875 = vmatprep.subr.bf16.mxu0 (!%p3544_p8), %v3874_v15 }
0x15c6   : > { %v2906_v27 = vpop.xlane.xlu1 %2905 }
0x15c7   : > { %v2909_v28 = vmul.f32 0.03125, %v2906_v27 }
0x15c9   : > { %v2911_v29 = vsub.f32 %v2898_v25, %v2909_v28 }
0x15ca   : > { %v2916_v30 = vpop.xlane.xlu1 %2915 }
0x15cb   : > { %v2920_v31 = vmul.f32 0.03125, %v2916_v30  ;;  %v2913_v32 = vmul.f32 %v2911_v29, %v2911_v29 }
0x15cd   : > { %v2922_v33 = vadd.f32 1e-12, %v2920_v31  ;;  %v2917_v37 = vsel %vm872_vm1, %v2913_v32, 0.0 }
0x15ce   : > { %2918 = vadd.xlane.f32.xlu1 %v2917_v37 }
0x15cf   : > { %4004 = vrsqrt.f32 %v2922_v33 }
0x15d9   : > { %v4005_v34 = vpop.eup %4004 }
0x15da   : > { %v2926_v39 = vmul.f32 %v4005_v34, %v2910_v20 }
0x15dc   : > { %v2934_v44 = vmul.f32 %v3536_v36, %v2926_v39  ;;  %v3541_v39 = vld [vmem:[%s798_s24] ss:$0 sm:$0xff] }
0x15de   : > { %v4840_v45 = vadd.f32 %v3537_v40, %v2934_v44 }
0x15e0   : > { %3777 = vmatprep.mubr.msk.f32.mxu1 %vm872_vm1, %v4840_v45 }
0x165b   : > { %v2919_v52 = vpop.xlane.xlu1 %2918 }
0x165c   : > { %v2921_v53 = vmul.f32 0.03125, %v2919_v52 }
0x165e   : > { %v2923_v54 = vadd.f32 1e-12, %v2921_v53 }
0x1660   : > { %4006 = vrsqrt.f32 %v2923_v54 }
0x166a   : > { %v4007_v55 = vpop.eup %4006 }
0x166b   : > { %v2927_v42 = vmul.f32 %v4007_v55, %v2911_v29 }
0x166d   : > { %v2935_v56 = vmul.f32 %v3536_v36, %v2927_v42 }
0x166f   : > { %v4848_v47 = vadd.f32 %v3537_v40, %v2935_v56 }
0x1671   : > { %3778 = vmatmul.mubr.msk.f32.vlgmr.msra.gmra.mrb[30].mxu1 %vm872_vm1, %v4848_v47 }
0x1744   : > { %v3779_v18 = vpop.f32.mrb[30].mxu1 }
0x1745   : > { %v3033_v35 = vadd.f32 %v3779_v18, %v3538_v17  ;;  %v3027_v19 = vpop.f32.mrb[31].mxu1 }
0x1746   : > { %v3028_v21 = vadd.f32 %v3538_v17, %v3027_v19  ;;  %v3878_v17 = vpack.c.bf16 (!%p3544_p8), %v3209_v16, %v3208_v13 }
0x1747   : > { %v3037_v22 = vmul.f32 %v3033_v35, %v3033_v35 }
0x1748   : > { %v3036_v23 = vmul.f32 %v3028_v21, %v3028_v21 }
0x1749   : > { %v3039_v20 = vmul.f32 %v3037_v22, %v3033_v35 }
0x174a   : > { %v3038_v24 = vmul.f32 %v3036_v23, %v3028_v21 }
0x174b   : > { %v3041_v25 = vmul.f32 0.044715, %v3039_v20 }
0x174c   : > { %v3040_v43 = vmul.f32 0.044715, %v3038_v24 }
0x174d   : > { %v3043_v26 = vadd.f32 %v3041_v25, %v3033_v35 }
0x174e   : > { %v3042_v38 = vadd.f32 %v3040_v43, %v3028_v21 }
0x174f   : > { %v3045_v27 = vmul.f32 0.7978846, %v3043_v26 }
0x1750   : > { %v3044_v28 = vmul.f32 0.7978846, %v3042_v38 }
0x1751   : > { %4008 = vtanh.f32 %v3045_v27 }
0x1752   : > { %4010 = vtanh.f32 %v3044_v28 }
0x175b   : > { %v4009_v29 = vpop.eup %4008 }
0x175c   : > { %v4011_v30 = vpop.eup %4010  ;;  %v3049_v31 = vadd.f32 1.0, %v4009_v29 }
0x175d   : > { %v3048_v32 = vadd.f32 1.0, %v4011_v30 }
0x175e   : > { %v3051_v33 = vmul.f32 0.5, %v3049_v31 }
0x175f   : > { %v3050_v37 = vmul.f32 0.5, %v3048_v32 }
0x1760   : > { %v3053_v36 = vmul.f32 %v3051_v33, %v3033_v35  ;;  %v3545_v35 = vld [vmem:[%s5008_s1] ss:$0 sm:$0xff] (!%p3544_p8) }
0x1761   : > { %v3052_v34 = vmul.f32 %v3050_v37, %v3028_v21 }
0x1763   : > { %3812 = vmatprep.mubr.f32.mxu0 %v3052_v34 }
0x1764   : > { %3813 = vmatmul.mubr.f32.vlgmr.msra.gmra.mrb[10].mxu0 %v3053_v36 }
0x1765   : > { %3877 = vmatpush3.bf16.msra.mxu0 (!%p3544_p8), %v3874_v15 }
0x1766   : > { %3879 = vmatprep.subr.bf16.mxu0 (!%p3544_p8), %v3878_v17 }
0x1769   : > { %3881 = vmatpush3.bf16.msra.mxu0 (!%p3544_p8), %v3878_v17 }
0x1837   : > { %v3814_v40 = vpop.f32.mrb[10].mxu0 }
0x1838   : > { %v3149_v44 = vadd.f32 %v3814_v40, %v3541_v39  ;;  %v3143_v46 = vpop.f32.mrb[11].mxu0 }
0x1839   : > { %v3144_v48 = vadd.f32 %v3541_v39, %v3143_v46 }
0x183a   : > { %v3153_v49 = vadd.f32 %v3149_v44, %v4848_v47 }
0x183b   : > { %v3152_v50 = vadd.f32 %v3144_v48, %v4840_v45 }
0x183c   : > { %v3159_v51 = vsel %vm872_vm1, %v3153_v49, 0.0 }
0x183d   : > { %3160 = vadd.xlane.f32.xlu1 %v3159_v51  ;;  %v3156_v62 = vsel %vm872_vm1, %v3152_v50, 0.0 }
0x183e   : > { %3157 = vadd.xlane.f32.xlu0 %v3156_v62 }
0x18ca   : > { %v3161_v52 = vpop.xlane.xlu1 %3160 }
0x18cb   : > { %v3163_v53 = vmul.f32 0.03125, %v3161_v52  ;;  %v3158_v54 = vpop.xlane.xlu0 %3157 }
0x18cc   : > { %v3162_v55 = vmul.f32 0.03125, %v3158_v54 }
0x18cd   : > { %v3165_v42 = vsub.f32 %v3153_v49, %v3163_v53 }
0x18ce   : > { %v3164_v56 = vsub.f32 %v3152_v50, %v3162_v55 }
0x18cf   : > { %v3167_v47 = vmul.f32 %v3165_v42, %v3165_v42 }
0x18d0   : > { %v3166_v57 = vmul.f32 %v3164_v56, %v3164_v56 }
0x18d1   : > { %v3171_v45 = vsel %vm872_vm1, %v3167_v47, 0.0 }
0x18d2   : > { %v3168_v58 = vsel %vm872_vm1, %v3166_v57, 0.0 }
0x18d3   : > { %3169 = vadd.xlane.f32.xlu1 %v3168_v58 }
0x18d7   : > { %3172 = vadd.xlane.f32.xlu1 %v3171_v45 }
0x1960   : > { %v3170_v59 = vpop.xlane.xlu1 %3169 }
0x1961   : > { %v3174_v60 = vmul.f32 0.03125, %v3170_v59 }
0x1963   : > { %v3176_v61 = vadd.f32 1e-12, %v3174_v60 }
0x1964   : > { %v3173_v0 = vpop.xlane.xlu1 %3172 }
0x1965   : > { %4012 = vrsqrt.f32 %v3176_v61  ;;  %v3175_v1 = vmul.f32 0.03125, %v3173_v0 }
0x1967   : > { %v3177_v2 = vadd.f32 1e-12, %v3175_v1 }
0x1969   : > { %4014 = vrsqrt.f32 %v3177_v2 }
0x196f   : > { %v4013_v3 = vpop.eup %4012 }
0x1970   : > { %v3180_v5 = vmul.f32 %v4013_v3, %v3164_v56 }
0x1972   : > { %v3188_v7 = vmul.f32 %v3542_v4, %v3180_v5 }
0x1973   : > { %v4015_v8 = vpop.eup %4014 }
0x1974   : > { %v3196_v9 = vadd.f32 %v3543_v6, %v3188_v7  ;;  %v3181_v63 = vmul.f32 %v4015_v8, %v3165_v42  ;;  %3203 = sbr.rel (%p3544_p8) target bundleno = 6740 (0x1a54), region = 116 }
0x1976   : > { %3198 = vst.msk [vmem:[#allocation2] sm:$0xff] %vm872_vm1, %v3196_v9  ;;  %v3189_v10 = vmul.f32 %v3542_v4, %v3181_v63  ;;  %v3204_v14 = vmax.f32 (!%p3544_p8), %v3196_v9, 0.0 }
0x1978   : > { %v3197_v11 = vadd.f32 %v3543_v6, %v3189_v10  ;;  %3823 = vmatprep.mubr.msk.f32.mxu0 (!%p3544_p8), %vm872_vm1, %v3204_v14 }
0x197a   : > { %3199 = vst.msk [vmem:[#allocation2 + $0x8] sm:$0xff] %vm872_vm1, %v3197_v11  ;;  %v3205_v18 = vmax.f32 (!%p3544_p8), %v3197_v11, 0.0 }
0x197c   : > { %3824 = vmatmul.mubr.msk.f32.vlgmr.msra.gmra.mrb[0].mxu0 %vm872_vm1, %v3205_v18 }
0x1a4f   : > { %v3825_v19 = vpop.f32.mrb[0].mxu0 }
0x1a50   : > { %v3295_v21 = vadd.f32 %v3825_v19, %v3545_v35  ;;  %v3289_v22 = vpop.f32.mrb[1].mxu0 }
0x1a51   : > { %v3290_v23 = vadd.f32 %v3545_v35, %v3289_v22 }
0x1a52   : > { %3299 = vst [vmem:[%s5009_s15 + $0x8] sm:$0xff] %v3295_v21 }
0x1a53   : > { %3298 = vst [vmem:[%s5009_s15] sm:$0xff] %v3290_v23 }
0x1a54 PF: > { %s5010_s30 = sld [smem:[#allocation15_spill]]  ;;  %s5011_s25 = sld [smem:[#allocation14_spill]] }
0x1a55   : > { %s5012_s29 = sld [smem:[#allocation16_spill]]  ;;  %s5013_s27 = smov %s4168_s28 }
0x1a5a   : > { %p32_p10 = scmp.ge.s32.totalorder %s5010_s30, 4   ;;  %s5014_s28 = smov %s5011_s25 }
0x1a5c   :  { %34 = sbr.rel (!%p32_p10) target bundleno = 20 (0x14), region = 192 }
0x1a63   :  { %3311 = vsyncpa [#allocation5], 1 }
0x1a64   :  { %3313 = vsyncpa [#allocation5 + $0x1], 1 }
0x1a65   :  { %3314 = vsyncpa [#allocation7], 1 }
0x1a66   :  { %3316 = vsyncpa [#allocation7 + $0x1], 1 }
0x1a67   :  { %3317 = vsyncpa [#allocation10], 1 }

</bundles_post_ra>
